<compile_context>
chip_gen: v7x
topology: tpu7x:2x2x1
jax: 0.10.0
libtpu: 0.0.40
codegen_flags: <defaults>
</compile_context>

<pallas_src>
import functools
import numpy as np
import jax
import jax.numpy as jnp
from jax.experimental import pallas as pl
from jax.experimental.pallas import tpu as pltpu


# ----------------------------- irreps configuration -----------------------------
IN_IRREPS  = [(4, 0, +1), (4, 1, -1)]   # "4x0e + 4x1o" -> dim 16
SH_IRREPS  = [(1, 0, +1), (1, 1, -1)]   # "1x0e + 1x1o" -> dim 4
OUT_IRREPS = [(4, 0, +1), (4, 1, -1)]   # "4x0e + 4x1o" -> dim 16
LANE = 128                              # lane-dense slab width for node tensors


def irreps_dim(irreps):
    return sum(mul * (2 * l + 1) for mul, l, _ in irreps)


def irreps_offsets(irreps):
    offs, o = [], 0
    for mul, l, _ in irreps:
        offs.append(o)
        o += mul * (2 * l + 1)
    return offs


def wigner_3j(l1, l2, l3):
    """Real Wigner-3j tensors for the l in {0, 1} paths used here."""
    if (l1, l2, l3) == (0, 0, 0):
        return np.ones((1, 1, 1))
    if (l1, l2, l3) == (0, 1, 1):
        return np.eye(3)[None, :, :] / np.sqrt(3.0)
    if (l1, l2, l3) == (1, 0, 1):
        return np.eye(3)[:, None, :] / np.sqrt(3.0)
    if (l1, l2, l3) == (1, 1, 0):
        return np.eye(3)[:, :, None] / np.sqrt(3.0)
    raise NotImplementedError((l1, l2, l3))


def build_tensor_product_basis(in_irreps, sh_irreps, out_irreps):
    """Dense basis for FullyConnectedTensorProduct (shared_weights=False).

    Returns T4 of shape [W, d_out, d_sh, d_in] and W (= weight_numel), with e3nn
    'component' irrep normalization and 'element' path normalization.
    """
    d_in, d_sh, d_out = map(irreps_dim, (in_irreps, sh_irreps, out_irreps))
    in_off, sh_off, out_off = map(irreps_offsets, (in_irreps, sh_irreps, out_irreps))

    instrs = []
    for i1, (mul1, l1, p1) in enumerate(in_irreps):
        for i2, (mul2, l2, p2) in enumerate(sh_irreps):
            for io, (mulo, lo, po) in enumerate(out_irreps):
                if abs(l1 - l2) <= lo <= l1 + l2 and p1 * p2 == po:
                    instrs.append((i1, i2, io))
    w_numel = sum(in_irreps[a][0] * sh_irreps[b][0] * out_irreps[c][0] for a, b, c in instrs)

    def fan_in(io):
        return sum(in_irreps[a][0] * sh_irreps[b][0] for a, b, c in instrs if c == io)

    basis = np.zeros((w_numel, d_out, d_sh, d_in), dtype=np.float32)
    w_off = 0
    for (i1, i2, io) in instrs:
        mul1, l1, _ = in_irreps[i1]
        mul2, l2, _ = sh_irreps[i2]
        mulo, lo, _ = out_irreps[io]
        d1, d2, d3 = 2 * l1 + 1, 2 * l2 + 1, 2 * lo + 1
        alpha = np.sqrt(d3 / fan_in(io))
        cg = alpha * wigner_3j(l1, l2, lo)
        for u in range(mul1):
            for v in range(mul2):
                for w in range(mulo):
                    widx = w_off + (u * mul2 + v) * mulo + w
                    i0 = in_off[i1] + u * d1
                    s0 = sh_off[i2] + v * d2
                    o0 = out_off[io] + w * d3
                    for m1 in range(d1):
                        for m2 in range(d2):
                            for m3 in range(d3):
                                basis[widx, o0 + m3, s0 + m2, i0 + m1] += cg[m1, m2, m3]
        w_off += mul1 * mul2 * mulo
    return basis, w_numel


def build_batchnorm_helpers(out_irreps, lane):
    """Lane-padded matrices that express e3nn BatchNorm without in-kernel reshapes."""
    d_out = irreps_dim(out_irreps)
    offs = irreps_offsets(out_irreps)
    n_ch = sum(mul for mul, _, _ in out_irreps)
    sq_reduce = np.zeros((lane, n_ch), dtype=np.float32)   # feature -> per-channel mean of squares
    expand = np.zeros((n_ch, lane), dtype=np.float32)      # per-channel scale -> per-feature scale
    scalar_mask = np.zeros((1, lane), dtype=np.float32)    # features of l=0 irreps
    c = 0
    for (mul, l, _), off in zip(out_irreps, offs):
        d = 2 * l + 1
        for u in range(mul):
            f0 = off + u * d
            sq_reduce[f0:f0 + d, c] = 1.0 / d               # 'component' normalization
            expand[c, f0:f0 + d] = 1.0
            if l == 0:
                scalar_mask[0, f0:f0 + d] = 1.0
            c += 1
    assert d_out <= lane
    return sq_reduce, expand, scalar_mask, n_ch


def build_expansion_matrices(din, dout, s_dim, w_numel):
    """Constant one-hot matrices replacing in-kernel lane concats with MXU matmuls."""
    # sh_expand[s, s*W + w] = 1   -> sh_rep[e, s*W+w] = sh[e, s]
    sh_expand = np.zeros((s_dim, s_dim * w_numel), dtype=np.float32)
    for s in range(s_dim):
        sh_expand[s, s * w_numel:(s + 1) * w_numel] = 1.0
    # x_expand[i, d*Din + i] = 1  -> x_rep[e, d*Din+i] = x[e, i]
    x_expand = np.zeros((din, dout * din), dtype=np.float32)
    for d in range(dout):
        x_expand[np.arange(din), d * din + np.arange(din)] = 1.0
    return sh_expand, x_expand


def _round_up(x, m):
    return ((x + m - 1) // m) * m


# ------------------------------ kernel 1: conv+scatter ----------------------------
def conv_scatter_kernel(xdst_ref, eattr_ref, esh_ref, esrc_ref, nres_ref,
                        fc1w_ref, fc1b_ref, fc2wrep_ref, fc2brep_ref,
                        shexp_ref, xexp_ref, basis_ref, g2_ref, out_ref):
    f32 = jnp.float32
    i = pl.program_id(0)                      # node tile  ("parallel")
    j = pl.program_id(1)                      # edge tile  ("arbitrary" reduction)
    tn, lane = out_ref.shape
    te, din = xdst_ref.shape
    dout = basis_ref.shape[1] // din
    count_col = dout                          # extra accumulator column for edge counts

    @pl.when(j == 0)
    def _init():
        out_ref[...] = jnp.zeros_like(out_ref)

    # --- per-edge MLP: edge_attr -> tensor-product weights ---
    h = jnp.dot(eattr_ref[...], fc1w_ref[...], preferred_element_type=f32) + fc1b_ref[...]
    h = jnp.maximum(h, 0.0)
    # TODO(synk): nn.Dropout(p=0.0) is the identity; nonzero training-mode dropout not implemented.
    # fc2 has the S-fold lane replication folded into its weights (host-side), so
    # wts_rep[e, s*W + w] = wts[e, w] comes straight out of one matmul.
    wts_rep = jnp.dot(h, fc2wrep_ref[...], preferred_element_type=f32) + fc2brep_ref[...]   # [TE, S*W]

    # --- tensor product, reordered: contract (weights x sh) with the basis first ---
    # sh replicated across the W lanes of each s-block via a constant one-hot matmul (MXU).
    sh_rep = jnp.dot(esh_ref[...], shexp_ref[...], preferred_element_type=f32)              # [TE, S*W]
    k_mat = jnp.dot(wts_rep * sh_rep, basis_ref[...], preferred_element_type=f32)           # [TE, Dout*Din]
    # gathered node features tiled Dout times across lanes via a constant one-hot matmul.
    g_rep = jnp.dot(xdst_ref[...], xexp_ref[...], preferred_element_type=f32)               # [TE, Dout*Din]
    # one multiply + one block-sum matmul produces the lane-dense per-edge TP slab.
    tp_slab = jnp.dot(k_mat * g_rep, g2_ref[...], preferred_element_type=f32)               # [TE, LANE]
    # the edge count rides along as one extra column of the same scatter matmul
    ones_col = (jax.lax.broadcasted_iota(jnp.int32, (1, lane), 1) == count_col).astype(f32)
    tp_slab = tp_slab + ones_col

    # --- scatter-add into the resident [TN, LANE] output block ---
    src = esrc_ref[...]                                                                     # [1, TE] int32
    row_ids = jax.lax.broadcasted_iota(jnp.int32, (tn, te), 0) + i * tn                     # [TN, TE]
    onehot = (row_ids == src).astype(f32)                                                   # [TN, TE]
    out_ref[...] += jnp.dot(onehot, tp_slab, preferred_element_type=f32)

    # --- finalize: scatter-mean + residual (padded node_attr slab) ---
    @pl.when(j == pl.num_programs(1) - 1)
    def _finalize():
        acc = out_ref[...]
        cnt = acc[:, count_col:count_col + 1]
        inv = pl.reciprocal(jnp.maximum(cnt, 1.0), approx=True)
        out_ref[...] = acc * inv + nres_ref[...]


# ------------------------------ kernel 2: batch norm -------------------------------
def batchnorm_kernel(y_ref, sqred_ref, expand_ref, mask_ref, bnw_ref, bias_ref,
                     out_ref, sum_ref, ssq_ref, *, n_true, eps=1e-5):
    # e3nn BatchNorm: training stats, reduce='mean', normalization='component', affine.
    # TODO(synk): running-mean/var buffer updates are training state, not output; omitted.
    f32 = jnp.float32
    p = pl.program_id(0)          # phase 0: accumulate stats, phase 1: normalize
    i = pl.program_id(1)          # node tile

    @pl.when(jnp.logical_and(p == 0, i == 0))
    def _init():
        sum_ref[...] = jnp.zeros_like(sum_ref)
        ssq_ref[...] = jnp.zeros_like(ssq_ref)

    y = y_ref[...]                                                   # [TN, LANE]

    @pl.when(p == 0)
    def _accumulate():
        sum_ref[...] += jnp.sum(y, axis=0, keepdims=True)
        ssq_ref[...] += jnp.sum(y * y, axis=0, keepdims=True)
        out_ref[...] = y                    # placeholder; overwritten in phase 1

    @pl.when(p == 1)
    def _normalize():
        inv_n = 1.0 / n_true
        mask = mask_ref[...]                                          # scalar (l=0) features
        mean = sum_ref[...] * inv_n * mask                            # only scalars are centered
        ex2 = ssq_ref[...] * inv_n
        var_feat = ex2 - mean * mean                                  # == E[(y-mean)^2] per feature
        norm_ch = jnp.dot(var_feat, sqred_ref[...], preferred_element_type=f32)   # [1, n_ch]
        inv_std = jax.lax.rsqrt(norm_ch + eps) * bnw_ref[...]
        scale = jnp.dot(inv_std, expand_ref[...], preferred_element_type=f32)      # [1, LANE]
        out_ref[...] = (y - mean) * scale + bias_ref[...]             # bias pre-masked to scalars


# --------------------------------- wrapper ----------------------------------------
def tensor_product_conv_layer(node_attr, edge_index, edge_attr, edge_sh, params,
                              *, tn=None, te=128):
    f32 = jnp.float32
    N, din = node_attr.shape
    E, nef = edge_attr.shape
    s_dim = edge_sh.shape[1]
    basis_perm = params["basis_perm"]
    g2 = params["g2"]
    dout = basis_perm.shape[1] // din
    lane = g2.shape[1]

    # auto-pick a node tile that covers the whole (padded) graph when it fits, so
    # the per-edge MLP / TP work is not recomputed once per node tile.
    if tn is None:
        tn = min(_round_up(N, 8), 512)
    n_pad = _round_up(N, tn)
    e_pad = _round_up(E, te)
    ni, nj = n_pad // tn, e_pad // te

    edge_src = edge_index[0].astype(jnp.int32)
    edge_dst = edge_index[1].astype(jnp.int32)

    # TODO(synk): the data-dependent row gather node_attr[edge_dst] is left to XLA's
    # native gather here (O(E*Din)); a per-row DMA gather inside the kernel is strictly
    # worse for 64-byte rows.
    x_dst = jnp.take(node_attr, edge_dst, axis=0)                                  # [E, Din]
    x_dst = jnp.pad(x_dst, ((0, e_pad - E), (0, 0)))
    eattr = jnp.pad(edge_attr, ((0, e_pad - E), (0, 0)))
    esh = jnp.pad(edge_sh, ((0, e_pad - E), (0, 0)))
    esrc = jnp.pad(edge_src, (0, e_pad - E), constant_values=-1).reshape(1, e_pad)  # -1 never matches
    # residual: F.pad(node_attr, (0, Dout - Din)) laid into a lane-dense [N_pad, LANE] slab
    nres = jnp.pad(node_attr, ((0, n_pad - N), (0, lane - din)))

    # fold the S-fold lane replication of the TP weights into fc2 (free, host-side)
    w_numel = params["fc2_w"].shape[1]
    fc2_w_rep = jnp.tile(params["fc2_w"], (1, s_dim))                               # [hidden, S*W]
    fc2_b_rep = jnp.tile(params["fc2_b"], (1, s_dim))                               # [1, S*W]

    conv_args = (x_dst, eattr, esh, esrc, nres,
                 params["fc1_w"], params["fc1_b"], fc2_w_rep, fc2_b_rep,
                 params["sh_expand"], params["x_expand"], basis_perm, g2)

    def edge_spec(cols):
        return pl.BlockSpec((te, cols), lambda i, j: (j, 0))

    def full2d(a):
        return pl.BlockSpec(a.shape, lambda i, j: (0, 0))

    y_slab = pl.pallas_call(
        conv_scatter_kernel,
        out_shape=jax.ShapeDtypeStruct((n_pad, lane), f32),
        grid=(ni, nj),
        in_specs=[
            edge_spec(din),                                 # gathered node features
            edge_spec(nef),                                 # edge_attr
            edge_spec(s_dim),                               # edge_sh
            pl.BlockSpec((1, te), lambda i, j: (0, j)),     # edge_src (row layout)
            pl.BlockSpec((tn, lane), lambda i, j: (i, 0)),  # residual slab
            full2d(params["fc1_w"]), full2d(params["fc1_b"]),
            full2d(fc2_w_rep), full2d(fc2_b_rep),
            full2d(params["sh_expand"]), full2d(params["x_expand"]),
            full2d(basis_perm), full2d(g2),
        ],
        out_specs=pl.BlockSpec((tn, lane), lambda i, j: (i, 0)),
        compiler_params=pltpu.CompilerParams(
            dimension_semantics=("parallel", "arbitrary"),
            vmem_limit_bytes=32 * 1024 * 1024),
    )(*conv_args)

    # --- BatchNorm (two-phase grid; bias restricted to scalar channels) ---
    bias_feat = (params["bn_bias"] @ params["expand"]) * params["scalar_mask"]      # [1, LANE]
    bn_args = (y_slab, params["sq_reduce"], params["expand"],
               params["scalar_mask"], params["bn_w"], bias_feat)

    def full2d_bn(a):
        return pl.BlockSpec(a.shape, lambda p_, i: (0, 0))

    out_slab = pl.pallas_call(
        functools.partial(batchnorm_kernel, n_true=float(N)),
        out_shape=jax.ShapeDtypeStruct((n_pad, lane), f32),
        grid=(2, ni),
        in_specs=[pl.BlockSpec((tn, lane), lambda p_, i: (i, 0))]
                + [full2d_bn(a) for a in bn_args[1:]],
        out_specs=pl.BlockSpec((tn, lane), lambda p_, i: (i, 0)),
        scratch_shapes=[pltpu.VMEM((1, lane), f32), pltpu.VMEM((1, lane), f32)],
        compiler_params=pltpu.CompilerParams(
            dimension_semantics=("arbitrary", "arbitrary"),
            vmem_limit_bytes=32 * 1024 * 1024),
    )(*bn_args)

    return out_slab[:N, :dout]


# ------------------------- pure-JAX reference (same math) ------------------------
def reference_forward(node_attr, edge_index, edge_attr, edge_sh, params, T4):
    N, din = node_attr.shape
    dout = T4.shape[1]
    edge_src, edge_dst = edge_index[0], edge_index[1]
    h = jnp.maximum(edge_attr @ params["fc1_w"] + params["fc1_b"], 0.0)
    wts = h @ params["fc2_w"] + params["fc2_b"]
    x1 = node_attr[edge_dst]
    tp = jnp.einsum("ew,wdsi,es,ei->ed", wts, jnp.asarray(T4), edge_sh, x1)
    out_sum = jnp.zeros((N, dout), jnp.float32).at[edge_src].add(tp)
    cnt = jnp.zeros((N,), jnp.float32).at[edge_src].add(1.0)
    out = out_sum / jnp.maximum(cnt, 1.0)[:, None]
    out = out + jnp.pad(node_attr, ((0, 0), (0, dout - din)))
    mask = params["scalar_mask"][:, :dout]
    sq_reduce = params["sq_reduce"][:dout, :]
    expand = params["expand"][:, :dout]
    mean = out.mean(0, keepdims=True) * mask
    xc = out - mean
    norm = ((xc * xc) @ sq_reduce).mean(0, keepdims=True)
    inv = jax.lax.rsqrt(norm + 1e-5) * params["bn_w"]
    scale = inv @ expand
    bias_feat = (params["bn_bias"] @ expand) * mask
    return xc * scale + bias_feat


# ------------------------------------ main ---------------------------------------
if __name__ == "__main__":
    key = jax.random.PRNGKey(0)
    N, E = 16, 300                                        # small graph; multiple edge tiles
    n_edge_features = 8
    hidden_features = n_edge_features                     # hidden_features=None default
    DIN = irreps_dim(IN_IRREPS)                           # 16
    S = irreps_dim(SH_IRREPS)                             # 4
    DOUT = irreps_dim(OUT_IRREPS)                         # 16

    T4, w_numel = build_tensor_product_basis(IN_IRREPS, SH_IRREPS, OUT_IRREPS)   # [W, Dout, S, Din]
    # basis_perm[s*W + w, d*Din + i] = T4[w, d, s, i]
    basis_perm = np.transpose(T4, (2, 0, 1, 3)).reshape(S * w_numel, DOUT * DIN).astype(np.float32)
    # lane-padded block-sum matrix: G2[d*Din + i, d] = 1
    g2 = np.zeros((DOUT * DIN, LANE), dtype=np.float32)
    for d in range(DOUT):
        g2[d * DIN:(d + 1) * DIN, d] = 1.0
    sh_expand, x_expand = build_expansion_matrices(DIN, DOUT, S, w_numel)

    sq_reduce, expand, scalar_mask, n_ch = build_batchnorm_helpers(OUT_IRREPS, LANE)

    ks = jax.random.split(key, 10)

    def linear_init(kw, kb, fan_in, fan_out):
        bound = 1.0 / np.sqrt(fan_in)
        w = jax.random.uniform(kw, (fan_in, fan_out), jnp.float32, -bound, bound)
        b = jax.random.uniform(kb, (1, fan_out), jnp.float32, -bound, bound)
        return w, b

    fc1_w, fc1_b = linear_init(ks[0], ks[1], n_edge_features, hidden_features)
    fc2_w, fc2_b = linear_init(ks[2], ks[3], hidden_features, w_numel)

    params = dict(
        fc1_w=fc1_w, fc1_b=fc1_b, fc2_w=fc2_w, fc2_b=fc2_b,
        basis_perm=jnp.asarray(basis_perm), g2=jnp.asarray(g2),
        sh_expand=jnp.asarray(sh_expand), x_expand=jnp.asarray(x_expand),
        sq_reduce=jnp.asarray(sq_reduce), expand=jnp.asarray(expand),
        scalar_mask=jnp.asarray(scalar_mask),
        bn_w=1.0 + 0.1 * jax.random.normal(ks[8], (1, n_ch), jnp.float32),
        bn_bias=0.1 * jax.random.normal(ks[9], (1, n_ch), jnp.float32),
    )

    node_attr = jax.random.normal(ks[4], (N, DIN), jnp.float32)
    edge_index = jax.random.randint(ks[5], (2, E), 0, N, jnp.int32)
    edge_attr = jax.random.normal(ks[6], (E, n_edge_features), jnp.float32)
    dirs = jax.random.normal(ks[7], (E, 3), jnp.float32)
    dirs = dirs / jnp.linalg.norm(dirs, axis=1, keepdims=True)
    edge_sh = jnp.concatenate(
        [jnp.ones((E, 1), jnp.float32), np.sqrt(3.0) * dirs], axis=1)   # component-normalized SH (l=0,1)

    out = tensor_product_conv_layer(node_attr, edge_index, edge_attr, edge_sh, params)
    out = jax.block_until_ready(out)

    ref = reference_forward(node_attr, edge_index, edge_attr, edge_sh, params, T4)
    np.testing.assert_allclose(np.asarray(out), np.asarray(ref), rtol=1e-2, atol=1e-2)
    print("KERNEL_OK")
</pallas_src>

<mosaic_0001>
module attributes {stable_mosaic.version = 11 : i64} {
  func.func @conv_scatter_kernel(%arg0: i32, %arg1: i32, %arg2: memref<128x16xf32, #tpu.memory_space<vmem>>, %arg3: memref<128x8xf32, #tpu.memory_space<vmem>>, %arg4: memref<128x4xf32, #tpu.memory_space<vmem>>, %arg5: memref<1x128xi32, #tpu.memory_space<vmem>>, %arg6: memref<16x128xf32, #tpu.memory_space<vmem>>, %arg7: memref<8x8xf32, #tpu.memory_space<vmem>>, %arg8: memref<1x8xf32, #tpu.memory_space<vmem>>, %arg9: memref<8x256xf32, #tpu.memory_space<vmem>>, %arg10: memref<1x256xf32, #tpu.memory_space<vmem>>, %arg11: memref<4x256xf32, #tpu.memory_space<vmem>>, %arg12: memref<16x256xf32, #tpu.memory_space<vmem>>, %arg13: memref<256x256xf32, #tpu.memory_space<vmem>>, %arg14: memref<256x128xf32, #tpu.memory_space<vmem>>, %arg15: memref<16x128xf32, #tpu.memory_space<vmem>>) attributes {dimension_semantics = [#tpu.dimension_semantics<parallel>, #tpu.dimension_semantics<arbitrary>], iteration_bounds = array<i64: 1, 3>, scalar_prefetch = 0 : i64, scratch_operands = 0 : i64, tpu.core_type = #tpu.core_type<tc>, window_params = [{transform_indices = @transform_0, window_bounds = array<i64: 128, 16>}, {transform_indices = @transform_1, window_bounds = array<i64: 128, 8>}, {transform_indices = @transform_2, window_bounds = array<i64: 128, 4>}, {transform_indices = @transform_3, window_bounds = array<i64: 1, 128>}, {transform_indices = @transform_4, window_bounds = array<i64: 16, 128>}, {pipeline_mode = #tpu.pipeline_mode<synchronous>, transform_indices = @transform_5, window_bounds = array<i64: 8, 8>}, {pipeline_mode = #tpu.pipeline_mode<synchronous>, transform_indices = @transform_6, window_bounds = array<i64: 1, 8>}, {pipeline_mode = #tpu.pipeline_mode<synchronous>, transform_indices = @transform_7, window_bounds = array<i64: 8, 256>}, {pipeline_mode = #tpu.pipeline_mode<synchronous>, transform_indices = @transform_8, window_bounds = array<i64: 1, 256>}, {pipeline_mode = #tpu.pipeline_mode<synchronous>, transform_indices = @transform_9, window_bounds = array<i64: 4, 256>}, {pipeline_mode = #tpu.pipeline_mode<synchronous>, transform_indices = @transform_10, window_bounds = array<i64: 16, 256>}, {pipeline_mode = #tpu.pipeline_mode<synchronous>, transform_indices = @transform_11, window_bounds = array<i64: 256, 256>}, {pipeline_mode = #tpu.pipeline_mode<synchronous>, transform_indices = @transform_12, window_bounds = array<i64: 256, 128>}, {transform_indices = @transform_13, window_bounds = array<i64: 16, 128>}]} {
    %c0_i32 = arith.constant 0 : i32
    %0 = arith.cmpi eq, %arg1, %c0_i32 : i32
    %1 = arith.extui %0 : i1 to i32
    %c0_i32_0 = arith.constant 0 : i32
    %2 = arith.cmpi ne, %1, %c0_i32_0 : i32
    scf.if %2 {
      %cst_37 = arith.constant 0.000000e+00 : f32
      %51 = vector.broadcast %cst_37 : f32 to vector<16x128xf32>
      %c0_38 = arith.constant 0 : index
      %c0_39 = arith.constant 0 : index
      %52 = vector.load %arg15[%c0_38, %c0_39] : memref<16x128xf32, #tpu.memory_space<vmem>>, vector<16x128xf32>
      tpu.vector_store %arg15[%c0_38, %c0_39], %51 {strides = array<i32>} : memref<16x128xf32, #tpu.memory_space<vmem>>, vector<16x128xf32>,
    } else {
    }
    %c0 = arith.constant 0 : index
    %c0_1 = arith.constant 0 : index
    %3 = vector.load %arg3[%c0, %c0_1] : memref<128x8xf32, #tpu.memory_space<vmem>>, vector<128x8xf32>
    %c0_2 = arith.constant 0 : index
    %c0_3 = arith.constant 0 : index
    %4 = vector.load %arg7[%c0_2, %c0_3] : memref<8x8xf32, #tpu.memory_space<vmem>>, vector<8x8xf32>
    %cst = arith.constant dense<0.000000e+00> : vector<128x8xf32>
    %5 = tpu.matmul %3, %4, %cst {dimension_numbers = #tpu.dot_dimension_numbers<[1], [0], [0], [1], [0, 0, 1, 1], [], []>} : vector<128x8xf32>, vector<8x8xf32>, vector<128x8xf32> -> vector<128x8xf32>
    %c0_4 = arith.constant 0 : index
    %c0_5 = arith.constant 0 : index
    %6 = vector.load %arg8[%c0_4, %c0_5] : memref<1x8xf32, #tpu.memory_space<vmem>>, vector<1x8xf32>
    %7 = vector.broadcast %6 : vector<1x8xf32> to vector<128x8xf32>
    %8 = arith.addf %5, %7 : vector<128x8xf32>
    %cst_6 = arith.constant 0.000000e+00 : f32
    %9 = vector.broadcast %cst_6 : f32 to vector<128x8xf32>
    %10 = arith.maximumf %8, %9 : vector<128x8xf32>
    %c0_7 = arith.constant 0 : index
    %c0_8 = arith.constant 0 : index
    %11 = vector.load %arg9[%c0_7, %c0_8] : memref<8x256xf32, #tpu.memory_space<vmem>>, vector<8x256xf32>
    %cst_9 = arith.constant dense<0.000000e+00> : vector<128x256xf32>
    %12 = tpu.matmul %10, %11, %cst_9 {dimension_numbers = #tpu.dot_dimension_numbers<[1], [0], [0], [1], [0, 0, 1, 1], [], []>} : vector<128x8xf32>, vector<8x256xf32>, vector<128x256xf32> -> vector<128x256xf32>
    %c0_10 = arith.constant 0 : index
    %c0_11 = arith.constant 0 : index
    %13 = vector.load %arg10[%c0_10, %c0_11] : memref<1x256xf32, #tpu.memory_space<vmem>>, vector<1x256xf32>
    %14 = vector.broadcast %13 : vector<1x256xf32> to vector<128x256xf32>
    %15 = arith.addf %12, %14 : vector<128x256xf32>
    %c0_12 = arith.constant 0 : index
    %c0_13 = arith.constant 0 : index
    %16 = vector.load %arg4[%c0_12, %c0_13] : memref<128x4xf32, #tpu.memory_space<vmem>>, vector<128x4xf32>
    %c0_14 = arith.constant 0 : index
    %c0_15 = arith.constant 0 : index
    %17 = vector.load %arg11[%c0_14, %c0_15] : memref<4x256xf32, #tpu.memory_space<vmem>>, vector<4x256xf32>
    %cst_16 = arith.constant dense<0.000000e+00> : vector<128x256xf32>
    %18 = tpu.matmul %16, %17, %cst_16 {dimension_numbers = #tpu.dot_dimension_numbers<[1], [0], [0], [1], [0, 0, 1, 1], [], []>} : vector<128x4xf32>, vector<4x256xf32>, vector<128x256xf32> -> vector<128x256xf32>
    %19 = arith.mulf %15, %18 : vector<128x256xf32>
    %c0_17 = arith.constant 0 : index
    %c0_18 = arith.constant 0 : index
    %20 = vector.load %arg13[%c0_17, %c0_18] : memref<256x256xf32, #tpu.memory_space<vmem>>, vector<256x256xf32>
    %cst_19 = arith.constant dense<0.000000e+00> : vector<128x256xf32>
    %21 = tpu.matmul %19, %20, %cst_19 {dimension_numbers = #tpu.dot_dimension_numbers<[1], [0], [0], [1], [0, 0, 1, 1], [], []>} : vector<128x256xf32>, vector<256x256xf32>, vector<128x256xf32> -> vector<128x256xf32>
    %c0_20 = arith.constant 0 : index
    %c0_21 = arith.constant 0 : index
    %22 = vector.load %arg2[%c0_20, %c0_21] : memref<128x16xf32, #tpu.memory_space<vmem>>, vector<128x16xf32>
    %c0_22 = arith.constant 0 : index
    %c0_23 = arith.constant 0 : index
    %23 = vector.load %arg12[%c0_22, %c0_23] : memref<16x256xf32, #tpu.memory_space<vmem>>, vector<16x256xf32>
    %cst_24 = arith.constant dense<0.000000e+00> : vector<128x256xf32>
    %24 = tpu.matmul %22, %23, %cst_24 {dimension_numbers = #tpu.dot_dimension_numbers<[1], [0], [0], [1], [0, 0, 1, 1], [], []>} : vector<128x16xf32>, vector<16x256xf32>, vector<128x256xf32> -> vector<128x256xf32>
    %25 = arith.mulf %21, %24 : vector<128x256xf32>
    %c0_25 = arith.constant 0 : index
    %c0_26 = arith.constant 0 : index
    %26 = vector.load %arg14[%c0_25, %c0_26] : memref<256x128xf32, #tpu.memory_space<vmem>>, vector<256x128xf32>
    %cst_27 = arith.constant dense<0.000000e+00> : vector<128x128xf32>
    %27 = tpu.matmul %25, %26, %cst_27 {dimension_numbers = #tpu.dot_dimension_numbers<[1], [0], [0], [1], [0, 0, 1, 1], [], []>} : vector<128x256xf32>, vector<256x128xf32>, vector<128x128xf32> -> vector<128x128xf32>
    %28 = tpu.iota {dimensions = array<i32: 1>} : vector<1x128xi32>
    %c16_i32 = arith.constant 16 : i32
    %29 = vector.broadcast %c16_i32 : i32 to vector<1x128xi32>
    %30 = arith.cmpi eq, %28, %29 : vector<1x128xi32>
    %31 = arith.extui %30 : vector<1x128xi1> to vector<1x128xi32>
    %32 = arith.sitofp %31 : vector<1x128xi32> to vector<1x128xf32>
    %33 = vector.broadcast %32 : vector<1x128xf32> to vector<128x128xf32>
    %34 = arith.addf %27, %33 : vector<128x128xf32>
    %c0_28 = arith.constant 0 : index
    %c0_29 = arith.constant 0 : index
    %35 = vector.load %arg5[%c0_28, %c0_29] : memref<1x128xi32, #tpu.memory_space<vmem>>, vector<1x128xi32>
    %36 = tpu.iota {dimensions = array<i32: 0>} : vector<16x128xi32>
    %c16_i32_30 = arith.constant 16 : i32
    %37 = arith.muli %arg0, %c16_i32_30 : i32
    %38 = vector.broadcast %37 : i32 to vector<16x128xi32>
    %39 = arith.addi %36, %38 : vector<16x128xi32>
    %40 = vector.broadcast %35 : vector<1x128xi32> to vector<16x128xi32>
    %41 = arith.cmpi eq, %39, %40 : vector<16x128xi32>
    %42 = arith.extui %41 : vector<16x128xi1> to vector<16x128xi32>
    %43 = arith.sitofp %42 : vector<16x128xi32> to vector<16x128xf32>
    %c0_31 = arith.constant 0 : index
    %c0_32 = arith.constant 0 : index
    %44 = vector.load %arg15[%c0_31, %c0_32] : memref<16x128xf32, #tpu.memory_space<vmem>>, vector<16x128xf32>
    %cst_33 = arith.constant dense<0.000000e+00> : vector<16x128xf32>
    %45 = tpu.matmul %43, %34, %cst_33 {dimension_numbers = #tpu.dot_dimension_numbers<[1], [0], [0], [1], [0, 0, 1, 1], [], []>} : vector<16x128xf32>, vector<128x128xf32>, vector<16x128xf32> -> vector<16x128xf32>
    %46 = arith.addf %44, %45 : vector<16x128xf32>
    %c0_34 = arith.constant 0 : index
    %c0_35 = arith.constant 0 : index
    %47 = vector.load %arg15[%c0_34, %c0_35] : memref<16x128xf32, #tpu.memory_space<vmem>>, vector<16x128xf32>
    tpu.vector_store %arg15[%c0_34, %c0_35], %46 {strides = array<i32>} : memref<16x128xf32, #tpu.memory_space<vmem>>, vector<16x128xf32>,
    %c2_i32 = arith.constant 2 : i32
    %48 = arith.cmpi eq, %arg1, %c2_i32 : i32
    %49 = arith.extui %48 : i1 to i32
    %c0_i32_36 = arith.constant 0 : i32
    %50 = arith.cmpi ne, %49, %c0_i32_36 : i32
    scf.if %50 {
      %c0_37 = arith.constant 0 : index
      %c0_38 = arith.constant 0 : index
      %51 = vector.load %arg15[%c0_37, %c0_38] : memref<16x128xf32, #tpu.memory_space<vmem>>, vector<16x128xf32>
      %52 = vector.extract_strided_slice %51 {offsets = [0, 16], sizes = [16, 1], strides = [1, 1]} : vector<16x128xf32> to vector<16x1xf32>
      %cst_39 = arith.constant 1.000000e+00 : f32
      %53 = vector.broadcast %cst_39 : f32 to vector<16x1xf32>
      %54 = arith.maximumf %52, %53 : vector<16x1xf32>
      %55 = tpu.reciprocal %54 {approx = true} : vector<16x1xf32> -> vector<16x1xf32>
      %56 = vector.broadcast %55 : vector<16x1xf32> to vector<16x128xf32>
      %57 = arith.mulf %51, %56 : vector<16x128xf32>
      %c0_40 = arith.constant 0 : index
      %c0_41 = arith.constant 0 : index
      %58 = vector.load %arg6[%c0_40, %c0_41] : memref<16x128xf32, #tpu.memory_space<vmem>>, vector<16x128xf32>
      %59 = arith.addf %57, %58 : vector<16x128xf32>
      %c0_42 = arith.constant 0 : index
      %c0_43 = arith.constant 0 : index
      %60 = vector.load %arg15[%c0_42, %c0_43] : memref<16x128xf32, #tpu.memory_space<vmem>>, vector<16x128xf32>
      tpu.vector_store %arg15[%c0_42, %c0_43], %59 {strides = array<i32>} : memref<16x128xf32, #tpu.memory_space<vmem>>, vector<16x128xf32>,
    } else {
    }
    return
  }
  func.func @transform_0(%arg0: i32, %arg1: i32) -> (i32, i32) {
    %c0_i32 = arith.constant 0 : i32
    %c0_i32_0 = arith.constant 0 : i32
    return %arg1, %c0_i32 : i32, i32
  }
  func.func @transform_1(%arg0: i32, %arg1: i32) -> (i32, i32) {
    %c0_i32 = arith.constant 0 : i32
    %c0_i32_0 = arith.constant 0 : i32
    return %arg1, %c0_i32 : i32, i32
  }
  func.func @transform_2(%arg0: i32, %arg1: i32) -> (i32, i32) {
    %c0_i32 = arith.constant 0 : i32
    %c0_i32_0 = arith.constant 0 : i32
    return %arg1, %c0_i32 : i32, i32
  }
  func.func @transform_3(%arg0: i32, %arg1: i32) -> (i32, i32) {
    %c0_i32 = arith.constant 0 : i32
    %c0_i32_0 = arith.constant 0 : i32
    return %c0_i32, %arg1 : i32, i32
  }
  func.func @transform_4(%arg0: i32, %arg1: i32) -> (i32, i32) {
    %c0_i32 = arith.constant 0 : i32
    %c0_i32_0 = arith.constant 0 : i32
    return %arg0, %c0_i32 : i32, i32
  }
  func.func @transform_5(%arg0: i32, %arg1: i32) -> (i32, i32) {
    %c0_i32 = arith.constant 0 : i32
    %c0_i32_0 = arith.constant 0 : i32
    %c0_i32_1 = arith.constant 0 : i32
    return %c0_i32, %c0_i32_0 : i32, i32
  }
  func.func @transform_6(%arg0: i32, %arg1: i32) -> (i32, i32) {
    %c0_i32 = arith.constant 0 : i32
    %c0_i32_0 = arith.constant 0 : i32
    %c0_i32_1 = arith.constant 0 : i32
    return %c0_i32, %c0_i32_0 : i32, i32
  }
  func.func @transform_7(%arg0: i32, %arg1: i32) -> (i32, i32) {
    %c0_i32 = arith.constant 0 : i32
    %c0_i32_0 = arith.constant 0 : i32
    %c0_i32_1 = arith.constant 0 : i32
    return %c0_i32, %c0_i32_0 : i32, i32
  }
  func.func @transform_8(%arg0: i32, %arg1: i32) -> (i32, i32) {
    %c0_i32 = arith.constant 0 : i32
    %c0_i32_0 = arith.constant 0 : i32
    %c0_i32_1 = arith.constant 0 : i32
    return %c0_i32, %c0_i32_0 : i32, i32
  }
  func.func @transform_9(%arg0: i32, %arg1: i32) -> (i32, i32) {
    %c0_i32 = arith.constant 0 : i32
    %c0_i32_0 = arith.constant 0 : i32
    %c0_i32_1 = arith.constant 0 : i32
    return %c0_i32, %c0_i32_0 : i32, i32
  }
  func.func @transform_10(%arg0: i32, %arg1: i32) -> (i32, i32) {
    %c0_i32 = arith.constant 0 : i32
    %c0_i32_0 = arith.constant 0 : i32
    %c0_i32_1 = arith.constant 0 : i32
    return %c0_i32, %c0_i32_0 : i32, i32
  }
  func.func @transform_11(%arg0: i32, %arg1: i32) -> (i32, i32) {
    %c0_i32 = arith.constant 0 : i32
    %c0_i32_0 = arith.constant 0 : i32
    %c0_i32_1 = arith.constant 0 : i32
    return %c0_i32, %c0_i32_0 : i32, i32
  }
  func.func @transform_12(%arg0: i32, %arg1: i32) -> (i32, i32) {
    %c0_i32 = arith.constant 0 : i32
    %c0_i32_0 = arith.constant 0 : i32
    %c0_i32_1 = arith.constant 0 : i32
    return %c0_i32, %c0_i32_0 : i32, i32
  }
  func.func @transform_13(%arg0: i32, %arg1: i32) -> (i32, i32) {
    %c0_i32 = arith.constant 0 : i32
    %c0_i32_0 = arith.constant 0 : i32
    return %arg0, %c0_i32 : i32, i32
  }
}

</mosaic_0001>

<bundles_post_ra>
// kernel: tpu_custom_call.1
= control target key start
LH: loop header
LB: loop body
LE: loop exit
PB: predicated region body
PF: predicated region fallthrough
CT: control target
= control target key end

     0   :  { %18 = vsyncpa [#allocation3], 0  ;;  %s2766_s25 = smov 0   ;;  %s2768_s26 = smov 0   ;;  %s3622_s0 = inlined_call_operand.vmem [shape: f32[384,16], index: 0, kind: input, shape index: {}]   ;;  %s3623_s1 = inlined_call_operand.vmem [shape: f32[384,8], index: 1, kind: input, shape index: {}]   ;;  %s3624_s2 = inlined_call_operand.vmem [shape: f32[384,4], index: 2, kind: input, shape index: {}]   ;;  %s3625_s3 = inlined_call_operand.vmem [shape: s32[1,384], index: 3, kind: input, shape index: {}]   ;;  %s3626_s4 = inlined_call_operand.vmem [shape: f32[16,128], index: 4, kind: input, shape index: {}]   ;;  %s3627_s5 = inlined_call_operand.vmem [shape: f32[8,8], index: 5, kind: input, shape index: {}]   ;;  %s3628_s6 = inlined_call_operand.vmem [shape: f32[1,8], index: 6, kind: input, shape index: {}]   ;;  %s3629_s7 = inlined_call_operand.vmem [shape: f32[8,256], index: 7, kind: input, shape index: {}]   ;;  %s3630_s8 = inlined_call_operand.vmem [shape: f32[1,256], index: 8, kind: input, shape index: {}]   ;;  %s3631_s9 = inlined_call_operand.vmem [shape: f32[4,256], index: 9, kind: input, shape index: {}]   ;;  %s3632_s10 = inlined_call_operand.vmem [shape: f32[16,256], index: 10, kind: input, shape index: {}]   ;;  %s3633_s11 = inlined_call_operand.vmem [shape: f32[256,256], index: 11, kind: input, shape index: {}]   ;;  %s3634_s12 = inlined_call_operand.vmem [shape: f32[256,128], index: 12, kind: input, shape index: {}]   ;;  %s3635_s13 = inlined_call_operand.hbm [shape: f32[16,128], index: 13, kind: output, shape index: {}]  }
   0x1   :  { %s2770_s27 = smov 0  }
   0x2 LB: > { %3637 = sst [smem:[#allocation5_spill]] %s2683_s26  ;;  %s33_s29 = sadd.s32 1, %s2683_s26  ;;  %s2687_s27 = sphi %s2770_s27, %s24_s27   ;;  %s2683_s26 = sphi %s2768_s26, %s3642_s26   ;;  %s2679_s25 = sphi %s2766_s25, %s3641_s25  }
   0x3   : > { %p34_p0 = scmp.ge.s32.totalorder %s33_s29, 3  ;;  %p2166_p1 = scmp.ge.s32.totalorder %s2687_s27, 1 }
   0x4   : > { %p442_p2 = scmp.lt.s32.totalorder %s2687_s27, 4 }
   0x5   : > { %s3644_s29 = smov (%p34_p0, %s33_s29), 0 }
   0x6   : > { %3638 = sst [smem:[#allocation6_spill]] %s3644_s29  ;;  %p443_p3 = pnand %p2166_p1, %p442_p2 }
   0x7   : > { %s2167_s30 = sshll.u32 (!%p443_p3), %s2679_s25, 4  ;;  %p517_p4 = scmp.lt.s32.totalorder (!%p443_p3), %s2679_s25, 2 }
   0x8   : > { %446 = sbr.rel (%p443_p3) target bundleno = 1371 (0x55b), region = 72  ;;  %p500_p5 = scmp.lt.s32.totalorder (!%p443_p3), %s2167_s30, 47 }
   0x9   : > { %p2173_p6 = scmp.ne.s32.totalorder (!%p443_p3), %s2679_s25, 0 }
   0xf   : > { %s2790_s14 = scalar_select %p517_p4, %s2679_s25, 2 }
  0x10   : > { %s3646_s30 = smov (!%p500_p5, %s2167_s30), 47  ;;  %530 = sbr.rel (%p2173_p6) target bundleno = 23 (0x17), region = 76 }
  0x11   : > { %s519_s17 = scalar_lea.vmem %s3625_s3, %s2790_s14  ;;  %s2168_s18 = sshll.u32 %s3646_s30, 3  ;;  %v2689_v0 = vmov (!%p2173_p6), 0.0  }
  0x12   : > { %s2799_s21 = scalar_lea.vmem %s3622_s0, %s2168_s18  ;;  %s2804_s24 = scalar_lea.vmem %s3623_s1, %s2168_s18  ;;  %531 = vst [vmem:[#allocation2] sm:$0xff] (!%p2173_p6), %v2689_v0  ;;  %532 = vst [vmem:[#allocation2 + $0x8] sm:$0xff] (!%p2173_p6), %v2689_v0 }
  0x13   : > { %s2809_s26 = scalar_lea.vmem %s3624_s2, %s2168_s18 }
  0x17 PF: > { %v549_v1 = vld [vmem:[%s3627_s5] sm:$0xff]  ;;  %vm557_vm0 = vcmask 64512   ;;  %v534_v3 = vld [vmem:[%s2804_s24 + $0x8] sm:$0xff]  ;;  %v535_v4 = vld [vmem:[%s2804_s24 + $0x10] sm:$0xff]  ;;  %vm1058_vm1 = vcmask 1043456   ;;  %v2690_v22 = vmov 0.0  }
  0x18   : > { %v533_v2 = vld [vmem:[%s2804_s24] sm:$0xff]  ;;  %2367 = vmatprep.subr.mxu0 %v549_v1  ;;  %v536_v5 = vld [vmem:[%s2804_s24 + $0x18] sm:$0xff]  ;;  %v538_v9 = vld [vmem:[%s2804_s24 + $0x28] sm:$0xff]  ;;  %893 = vmatprep.mubr.f32.mxu1 %v2690_v22  ;;  %vm1009_vm2 = vcmask 31744   ;;  %vm1501_vm3 = vcmask 130048   ;;  %p2247_p7 = scmp.ne.s32.totalorder %s2679_s25, 2 }
  0x19   : > { %2369 = vmatprep.mubr.msk.f32.mxu0 %vm557_vm0, %v533_v2  ;;  %2368 = vmatpush3.msra.mxu0 %v549_v1  ;;  %v537_v6 = vld [vmem:[%s2804_s24 + $0x20] sm:$0xff]  ;;  %v539_v10 = vld [vmem:[%s2804_s24 + $0x30] sm:$0xff]  ;;  %v540_v11 = vld [vmem:[%s2804_s24 + $0x38] sm:$0xff] }
  0x1a   : > { %2370 = vmatmul.mubr.msk.f32.vlgmr.msra.gmra.mrb[0].mxu0 %vm557_vm0, %v534_v3  ;;  %v1006_v7 = vld [vmem:[%s3631_s9] sm:$0xff]  ;;  %v542_v13 = vld [vmem:[%s2804_s24 + $0x48] sm:$0xff]  ;;  %v543_v14 = vld [vmem:[%s2804_s24 + $0x50] sm:$0xff] }
  0x1b   : > { %2372 = vmatprep.mubr.msk.f32.mxu0 %vm557_vm0, %v535_v4  ;;  %v1008_v8 = vcombine.high %v1006_v7, %v1006_v7  ;;  %v541_v12 = vld [vmem:[%s2804_s24 + $0x40] sm:$0xff]  ;;  %v544_v15 = vld [vmem:[%s2804_s24 + $0x58] sm:$0xff]  ;;  %v546_v17 = vld [vmem:[%s2804_s24 + $0x68] sm:$0xff] }
  0x1c   : > { %v545_v16 = vld [vmem:[%s2804_s24 + $0x60] sm:$0xff]  ;;  %v547_v18 = vld [vmem:[%s2804_s24 + $0x70] sm:$0xff]  ;;  %v548_v19 = vld [vmem:[%s2804_s24 + $0x78] sm:$0xff] }
  0x1d   : > { %2207 = vmatprep.subr.msk.mxu0 %vm1058_vm1, %v1008_v8  ;;  %v768_v20 = vld [vmem:[%s3629_s7 + $0x8] sm:$0xff]  ;;  %v767_v21 = vld [vmem:[%s3629_s7] sm:$0xff]  ;;  %v992_v25 = vld [vmem:[%s2809_s26 + $0x10] sm:$0xff] }
  0x1e   : > { %2373 = vmatmul.mubr.msk.f32.gmra.mrb[2].mxu0 %vm557_vm0, %v536_v5  ;;  %829 = vmatprep.subr.mxu1 %v768_v20  ;;  %v990_v23 = vld [vmem:[%s2809_s26] sm:$0xff]  ;;  %v991_v24 = vld [vmem:[%s2809_s26 + $0x8] sm:$0xff]  ;;  %v993_v26 = vld [vmem:[%s2809_s26 + $0x18] sm:$0xff] }
  0x1f   : > { %2375 = vmatprep.mubr.msk.f32.mxu0 %vm557_vm0, %v537_v6  ;;  %2208 = vmatpush1.msk.msra.mxu0 %vm1058_vm1, %v1006_v7  ;;  %v994_v27 = vld [vmem:[%s2809_s26 + $0x20] sm:$0xff]  ;;  %v995_v28 = vld [vmem:[%s2809_s26 + $0x28] sm:$0xff]  ;;  %v996_v29 = vld [vmem:[%s2809_s26 + $0x30] sm:$0xff] }
  0x20   : > { %830 = vmatpush1.msra.mxu1 %v767_v21  ;;  %v997_v30 = vld [vmem:[%s2809_s26 + $0x38] sm:$0xff]  ;;  %v998_v31 = vld [vmem:[%s2809_s26 + $0x40] sm:$0xff]  ;;  %v999_v32 = vld [vmem:[%s2809_s26 + $0x48] sm:$0xff] }
  0x21   : > { %v1000_v33 = vld [vmem:[%s2809_s26 + $0x50] sm:$0xff]  ;;  %v1001_v34 = vld [vmem:[%s2809_s26 + $0x58] sm:$0xff]  ;;  %v1002_v35 = vld [vmem:[%s2809_s26 + $0x60] sm:$0xff] }
  0x22   : > { %2376 = vmatmul.mubr.msk.f32.gmra.mrb[4].mxu0 %vm557_vm0, %v538_v9  ;;  %v1003_v36 = vld [vmem:[%s2809_s26 + $0x68] sm:$0xff]  ;;  %v1004_v37 = vld [vmem:[%s2809_s26 + $0x70] sm:$0xff]  ;;  %v1005_v38 = vld [vmem:[%s2809_s26 + $0x78] sm:$0xff] }
  0x23   : > { %2378 = vmatprep.mubr.msk.f32.mxu0 %vm557_vm0, %v539_v10  ;;  %v1257_v39 = vld [vmem:[%s3633_s11 + $0x8] sm:$0xff]  ;;  %v1259_v40 = vld [vmem:[%s3633_s11 + $0x18] sm:$0xff]  ;;  %v1256_v42 = vld [vmem:[%s3633_s11] sm:$0xff] }
  0x24   : > { %v2428_v41 = vpack.c.bf16 %v1259_v40, %v1257_v39  ;;  %v1258_v43 = vld [vmem:[%s3633_s11 + $0x10] sm:$0xff]  ;;  %v1261_v44 = vld [vmem:[%s3633_s11 + $0x28] sm:$0xff]  ;;  %v1263_v46 = vld [vmem:[%s3633_s11 + $0x38] sm:$0xff] }
  0x25   : > { %v2920_v45 = vpack.c.bf16 %v1258_v43, %v1256_v42  ;;  %v1260_v47 = vld [vmem:[%s3633_s11 + $0x20] sm:$0xff]  ;;  %v1262_v48 = vld [vmem:[%s3633_s11 + $0x30] sm:$0xff]  ;;  %v2931_v49 = vpack.c.bf16 %v1263_v46, %v1261_v44  ;;  %v1265_v50 = vld [vmem:[%s3633_s11 + $0x48] sm:$0xff] }
  0x26   : > { %2379 = vmatmul.mubr.msk.f32.gmra.mrb[6].mxu0 %vm557_vm0, %v540_v11  ;;  %2429 = vmatprep.subr.bf16.mxu0 %v2428_v41  ;;  %v1267_v51 = vld [vmem:[%s3633_s11 + $0x58] sm:$0xff]  ;;  %v2940_v52 = vpack.c.bf16 %v1262_v48, %v1260_v47  ;;  %v1264_v54 = vld [vmem:[%s3633_s11 + $0x40] sm:$0xff]  ;;  %v1266_v55 = vld [vmem:[%s3633_s11 + $0x50] sm:$0xff] }
  0x27   : > { %2381 = vmatprep.mubr.msk.f32.mxu0 %vm557_vm0, %v541_v12  ;;  %2560 = vmatprep.subr.bf16.mxu1 %v2428_v41  ;;  %v2943_v53 = vpack.c.bf16 %v1267_v51, %v1265_v50  ;;  %v1269_v56 = vld [vmem:[%s3633_s11 + $0x68] sm:$0xff]  ;;  %v1271_v57 = vld [vmem:[%s3633_s11 + $0x78] sm:$0xff]  ;;  %v2958_v58 = vpack.c.bf16 %v1266_v55, %v1264_v54  ;;  %v1268_v60 = vld [vmem:[%s3633_s11 + $0x60] sm:$0xff] }
  0x28   : > { %v2961_v59 = vpack.c.bf16 %v1271_v57, %v1269_v56  ;;  %v1270_v61 = vld [vmem:[%s3633_s11 + $0x70] sm:$0xff]  ;;  %v1273_v62 = vld [vmem:[%s3633_s11 + $0x88] sm:$0xff]  ;;  %v1275_v63 = vld [vmem:[%s3633_s11 + $0x98] sm:$0xff] }
  0x29   : > { %v2976_v0 = vpack.c.bf16 %v1270_v61, %v1268_v60  ;;  %v2979_v1 = vpack.c.bf16 %v1275_v63, %v1273_v62  ;;  %v1272_v2 = vld [vmem:[%s3633_s11 + $0x80] sm:$0xff]  ;;  %v1274_v3 = vld [vmem:[%s3633_s11 + $0x90] sm:$0xff]  ;;  %v1277_v4 = vld [vmem:[%s3633_s11 + $0xa8] sm:$0xff] }
  0x2a   : > { %2382 = vmatmul.mubr.msk.f32.gmra.mrb[8].mxu0 %vm557_vm0, %v542_v13  ;;  %v1279_v5 = vld [vmem:[%s3633_s11 + $0xb8] sm:$0xff]  ;;  %v2994_v6 = vpack.c.bf16 %v1274_v3, %v1272_v2  ;;  %v1276_v8 = vld [vmem:[%s3633_s11 + $0xa0] sm:$0xff]  ;;  %v1278_v9 = vld [vmem:[%s3633_s11 + $0xb0] sm:$0xff] }
  0x2b   : > { %2384 = vmatprep.mubr.msk.f32.mxu0 %vm557_vm0, %v543_v14  ;;  %v2997_v7 = vpack.c.bf16 %v1279_v5, %v1277_v4  ;;  %v1281_v10 = vld [vmem:[%s3633_s11 + $0xc8] sm:$0xff]  ;;  %v1283_v11 = vld [vmem:[%s3633_s11 + $0xd8] sm:$0xff]  ;;  %v3012_v12 = vpack.c.bf16 %v1278_v9, %v1276_v8  ;;  %v1280_v14 = vld [vmem:[%s3633_s11 + $0xc0] sm:$0xff] }
  0x2c   : > { %v3015_v13 = vpack.c.bf16 %v1283_v11, %v1281_v10  ;;  %v1284_v20 = vld [vmem:[%s3633_s11 + $0xe0] sm:$0xff]  ;;  %v1286_v21 = vld [vmem:[%s3633_s11 + $0xf0] sm:$0xff]  ;;  %v1301_v41 = vld [vmem:[%s3633_s11 + $0x168] sm:$0xff] }
  0x2d   : > { %v1296_v39 = vld [vmem:[%s3633_s11 + $0x140] sm:$0xff]  ;;  %v1298_v40 = vld [vmem:[%s3633_s11 + $0x150] sm:$0xff]  ;;  %v1303_v42 = vld [vmem:[%s3633_s11 + $0x178] sm:$0xff] }
  0x2e   : > { %2385 = vmatmul.mubr.msk.f32.gmra.mrb[10].mxu0 %vm557_vm0, %v544_v15  ;;  %v1282_v15 = vld [vmem:[%s3633_s11 + $0xd0] sm:$0xff]  ;;  %v3102_v43 = vpack.c.bf16 %v1298_v40, %v1296_v39  ;;  %v3105_v44 = vpack.c.bf16 %v1303_v42, %v1301_v41  ;;  %v1300_v46 = vld [vmem:[%s3633_s11 + $0x160] sm:$0xff]  ;;  %v1305_v48 = vld [vmem:[%s3633_s11 + $0x188] sm:$0xff] }
  0x2f   : > { %2387 = vmatprep.mubr.msk.f32.mxu0 %vm557_vm0, %v545_v16  ;;  %v1285_v16 = vld [vmem:[%s3633_s11 + $0xe8] sm:$0xff]  ;;  %v1302_v47 = vld [vmem:[%s3633_s11 + $0x170] sm:$0xff]  ;;  %v1307_v50 = vld [vmem:[%s3633_s11 + $0x198] sm:$0xff] }
  0x30   : > { %v3120_v51 = vpack.c.bf16 %v1302_v47, %v1300_v46  ;;  %v3123_v54 = vpack.c.bf16 %v1307_v50, %v1305_v48  ;;  %v1304_v55 = vld [vmem:[%s3633_s11 + $0x180] sm:$0xff]  ;;  %v1306_v56 = vld [vmem:[%s3633_s11 + $0x190] sm:$0xff]  ;;  %v1309_v57 = vld [vmem:[%s3633_s11 + $0x1a8] sm:$0xff] }
  0x31   : > { %v1311_v60 = vld [vmem:[%s3633_s11 + $0x1b8] sm:$0xff]  ;;  %v3138_v61 = vpack.c.bf16 %v1306_v56, %v1304_v55  ;;  %v1308_v63 = vld [vmem:[%s3633_s11 + $0x1a0] sm:$0xff]  ;;  %v1310_v2 = vld [vmem:[%s3633_s11 + $0x1b0] sm:$0xff] }
  0x32   : > { %2388 = vmatmul.mubr.msk.f32.gmra.mrb[12].mxu0 %vm557_vm0, %v546_v17  ;;  %v1287_v17 = vld [vmem:[%s3633_s11 + $0xf8] sm:$0xff]  ;;  %v3141_v62 = vpack.c.bf16 %v1311_v60, %v1309_v57  ;;  %v1313_v3 = vld [vmem:[%s3633_s11 + $0x1c8] sm:$0xff]  ;;  %v3156_v5 = vpack.c.bf16 %v1310_v2, %v1308_v63  ;;  %v3166_v9 = vld [vmem:[%s3628_s6] ss:$0 sm:$0xff] }
  0x33   : > { %2390 = vmatprep.mubr.msk.f32.mxu0 %vm557_vm0, %v547_v18  ;;  %v3030_v18 = vpack.c.bf16 %v1282_v15, %v1280_v14  ;;  %v1315_v4 = vld [vmem:[%s3633_s11 + $0x1d8] sm:$0xff]  ;;  %v1317_v56 = vld [vmem:[%s3633_s11 + $0x1e8] sm:$0xff]  ;;  %v1318_v63 = vld [vmem:[%s3633_s11 + $0x1f0] sm:$0xff] }
  0x34   : > { %v3159_v8 = vpack.c.bf16 %v1315_v4, %v1313_v3  ;;  %v1319_v57 = vld [vmem:[%s3633_s11 + $0x1f8] sm:$0xff] }
  0x36   : > { %2391 = vmatmul.mubr.msk.f32.gmra.mrb[14].mxu0 %vm557_vm0, %v548_v19  ;;  %v3033_v19 = vpack.c.bf16 %v1287_v17, %v1285_v16 }
  0x37   : > { %1127 = vmatprep.mubr.f32.mxu0 %v2690_v22 }
  0x3a   : > { %2209 = vmatmul.mubr.msk.f32.vlgmr.msra.gmra.mrb[16].mxu0 %vm1009_vm2, %v990_v23  ;;  %v1289_v23 = vld [vmem:[%s3633_s11 + $0x108] sm:$0xff] }
  0x3b   : > { %1133 = vmatprep.mubr.f32.mxu0 %v2690_v22  ;;  %2431 = vmatpush1.bf16.msra.mxu0 %v2920_v45 }
  0x3c   : > { %2433 = vmatprep.subr.bf16.mxu0 %v2931_v49 }
  0x3e   : > { %2210 = vmatmul.mubr.msk.f32.gmra.mrb[18].mxu0 %vm1009_vm2, %v991_v24  ;;  %v1291_v24 = vld [vmem:[%s3633_s11 + $0x118] sm:$0xff] }
  0x3f   : > { %1139 = vmatprep.mubr.f32.mxu0 %v2690_v22  ;;  %2435 = vmatpush1.bf16.msra.mxu0 %v2940_v52 }
  0x40   : > { %2437 = vmatprep.subr.bf16.mxu0 %v2943_v53 }
  0x42   : > { %2211 = vmatmul.mubr.msk.f32.gmra.mrb[20].mxu0 %vm1009_vm2, %v992_v25  ;;  %v3048_v25 = vpack.c.bf16 %v1286_v21, %v1284_v20 }
  0x43   : > { %1145 = vmatprep.mubr.f32.mxu0 %v2690_v22  ;;  %2439 = vmatpush1.bf16.msra.mxu0 %v2958_v58 }
  0x44   : > { %2441 = vmatprep.subr.bf16.mxu0 %v2961_v59 }
  0x46   : > { %2212 = vmatmul.mubr.msk.f32.gmra.mrb[22].mxu0 %vm1009_vm2, %v993_v26  ;;  %v3051_v26 = vpack.c.bf16 %v1291_v24, %v1289_v23 }
  0x47   : > { %1151 = vmatprep.mubr.f32.mxu0 %v2690_v22  ;;  %2443 = vmatpush1.bf16.msra.mxu0 %v2976_v0 }
  0x48   : > { %2445 = vmatprep.subr.bf16.mxu0 %v2979_v1 }
  0x4a   : > { %2213 = vmatmul.mubr.msk.f32.gmra.mrb[24].mxu0 %vm1009_vm2, %v994_v27  ;;  %v1288_v27 = vld [vmem:[%s3633_s11 + $0x100] sm:$0xff] }
  0x4b   : > { %1157 = vmatprep.mubr.f32.mxu0 %v2690_v22  ;;  %2447 = vmatpush1.bf16.msra.mxu0 %v2994_v6 }
  0x4c   : > { %2449 = vmatprep.subr.bf16.mxu0 %v2997_v7 }
  0x4e   : > { %2214 = vmatmul.mubr.msk.f32.gmra.mrb[26].mxu0 %vm1009_vm2, %v995_v28  ;;  %v1290_v28 = vld [vmem:[%s3633_s11 + $0x110] sm:$0xff] }
  0x4f   : > { %1163 = vmatprep.mubr.f32.mxu0 %v2690_v22  ;;  %2451 = vmatpush1.bf16.msra.mxu0 %v3012_v12 }
  0x50   : > { %2453 = vmatprep.subr.bf16.mxu0 %v3015_v13 }
  0x52   : > { %2215 = vmatmul.mubr.msk.f32.gmra.mrb[28].mxu0 %vm1009_vm2, %v996_v29  ;;  %v1293_v29 = vld [vmem:[%s3633_s11 + $0x128] sm:$0xff] }
  0x53   : > { %1169 = vmatprep.mubr.f32.mxu0 %v2690_v22  ;;  %2455 = vmatpush1.bf16.msra.mxu0 %v3030_v18 }
  0x54   : > { %2457 = vmatprep.subr.bf16.mxu0 %v3033_v19 }
  0x56   : > { %2216 = vmatmul.mubr.msk.f32.gmra.mrb[30].mxu0 %vm1009_vm2, %v997_v30  ;;  %v1295_v30 = vld [vmem:[%s3633_s11 + $0x138] sm:$0xff] }
  0x57   : > { %1175 = vmatprep.mubr.f32.mxu0 %v2690_v22  ;;  %2459 = vmatpush1.bf16.msra.mxu0 %v3048_v25 }
  0x58   : > { %2461 = vmatprep.subr.bf16.mxu0 %v3051_v26 }
  0x5a   : > { %2217 = vmatmul.mubr.msk.f32.gmra.mrb[32].mxu0 %vm1009_vm2, %v998_v31  ;;  %v3066_v31 = vpack.c.bf16 %v1290_v28, %v1288_v27 }
  0x5b   : > { %1181 = vmatprep.mubr.f32.mxu0 %v2690_v22 }
  0x5c   : > { %2463 = vmatpush1.bf16.msra.mxu0 %v3066_v31 }
  0x5e   : > { %2218 = vmatmul.mubr.msk.f32.gmra.mrb[34].mxu0 %vm1009_vm2, %v999_v32  ;;  %v3069_v32 = vpack.c.bf16 %v1295_v30, %v1293_v29 }
  0x5f   : > { %1187 = vmatprep.mubr.f32.mxu0 %v2690_v22 }
  0x60   : > { %2465 = vmatprep.subr.bf16.mxu0 %v3069_v32 }
  0x62   : > { %2219 = vmatmul.mubr.msk.f32.gmra.mrb[36].mxu0 %vm1009_vm2, %v1000_v33  ;;  %v1292_v33 = vld [vmem:[%s3633_s11 + $0x120] sm:$0xff] }
  0x63   : > { %1193 = vmatprep.mubr.f32.mxu0 %v2690_v22 }
  0x66   : > { %2220 = vmatmul.mubr.msk.f32.gmra.mrb[38].mxu0 %vm1009_vm2, %v1001_v34  ;;  %v1294_v34 = vld [vmem:[%s3633_s11 + $0x130] sm:$0xff] }
  0x67   : > { %1199 = vmatprep.mubr.f32.mxu0 %v2690_v22 }
  0x6a   : > { %2221 = vmatmul.mubr.msk.f32.gmra.mrb[40].mxu0 %vm1009_vm2, %v1002_v35  ;;  %v1297_v35 = vld [vmem:[%s3633_s11 + $0x148] sm:$0xff] }
  0x6b   : > { %1205 = vmatprep.mubr.f32.mxu0 %v2690_v22 }
  0x6e   : > { %2222 = vmatmul.mubr.msk.f32.gmra.mrb[42].mxu0 %vm1009_vm2, %v1003_v36  ;;  %v1299_v36 = vld [vmem:[%s3633_s11 + $0x158] sm:$0xff] }
  0x6f   : > { %1211 = vmatprep.mubr.f32.mxu0 %v2690_v22 }
  0x72   : > { %2223 = vmatmul.mubr.msk.f32.gmra.mrb[44].mxu0 %vm1009_vm2, %v1004_v37  ;;  %v3084_v37 = vpack.c.bf16 %v1294_v34, %v1292_v33 }
  0x73   : > { %1217 = vmatprep.mubr.f32.mxu0 %v2690_v22 }
  0x74   : > { %2467 = vmatpush1.bf16.msra.mxu0 %v3084_v37 }
  0x76   : > { %2224 = vmatmul.mubr.msk.f32.gmra.mrb[46].mxu0 %vm1009_vm2, %v1005_v38  ;;  %v3087_v38 = vpack.c.bf16 %v1299_v36, %v1297_v35 }
  0x78   : > { %2469 = vmatprep.subr.bf16.mxu0 %v3087_v38 }
  0x79   : > { %2471 = vmatpush1.bf16.msra.mxu0 %v3102_v43 }
  0x7a   : > { %2473 = vmatprep.subr.bf16.mxu0 %v3105_v44 }
  0x7d   : > { %2475 = vmatpush1.bf16.msra.mxu0 %v3120_v51 }
  0x7e   : > { %2477 = vmatprep.subr.bf16.mxu0 %v3123_v54 }
  0x81   : > { %2479 = vmatpush1.bf16.msra.mxu0 %v3138_v61 }
  0x82   : > { %2481 = vmatprep.subr.bf16.mxu0 %v3141_v62 }
  0x85   : > { %2483 = vmatpush1.bf16.msra.mxu0 %v3156_v5 }
  0x86   : > { %2485 = vmatprep.subr.bf16.mxu0 %v3159_v8 }
  0xed   : > { %v2371_v10 = vpop.f32.mrb[0].mxu0 }
  0xee   : > { %v672_v11 = vpop.f32.mrb[1].mxu0  ;;  %v678_v15 = vadd.f32 %v2371_v10, %v3166_v9  ;;  %v1498_v10 = vld [vmem:[%s3632_s10 + $0x8] sm:$0xff] }
  0xef   : > { %v673_v14 = vadd.f32 %v3166_v9, %v672_v11  ;;  %v1500_v11 = vld [vmem:[%s3632_s10 + $0x18] sm:$0xff] }
  0xf0   : > { %v752_v23 = vmax.f32 %v678_v15, 0.0 }
  0xf1   : > { %v751_v16 = vmax.f32 %v673_v14, 0.0  ;;  %v2374_v17 = vpop.f32.mrb[2].mxu0  ;;  %v2492_v14 = vpack.c.bf16 %v1500_v11, %v1498_v10 }
  0xf2   : > { %v682_v20 = vpop.f32.mrb[3].mxu0  ;;  %v688_v29 = vadd.f32 %v2374_v17, %v3166_v9 }
  0xf3   : > { %2191 = vmatmul.mubr.msk.f32.vlgmr.msra.gmra.mrb[0].mxu1 %vm557_vm0, %v751_v16  ;;  %v683_v21 = vadd.f32 %v3166_v9, %v682_v20 }
  0xf4   : > { %899 = vmatprep.mubr.f32.mxu1 %v2690_v22  ;;  %2576 = vmatpush1.bf16.msra.mxu1 %v2920_v45 }
  0xf5   : > { %v2377_v24 = vpop.f32.mrb[4].mxu0  ;;  %2561 = vmatprep.subr.bf16.mxu1 %v2931_v49  ;;  %v753_v28 = vmax.f32 %v683_v21, 0.0  ;;  %v754_v49 = vmax.f32 %v688_v29, 0.0 }
  0xf6   : > { %v692_v27 = vpop.f32.mrb[5].mxu0 }
  0xf7   : > { %2192 = vmatmul.mubr.msk.f32.gmra.mrb[2].mxu1 %vm557_vm0, %v752_v23  ;;  %v693_v45 = vadd.f32 %v3166_v9, %v692_v27 }
  0xf8   : > { %905 = vmatprep.mubr.f32.mxu1 %v2690_v22  ;;  %2577 = vmatpush1.bf16.msra.mxu1 %v2940_v52  ;;  %v698_v52 = vadd.f32 %v2377_v24, %v3166_v9 }
  0xf9   : > { %v2380_v30 = vpop.f32.mrb[6].mxu0  ;;  %2562 = vmatprep.subr.bf16.mxu1 %v2943_v53  ;;  %v755_v36 = vmax.f32 %v693_v45, 0.0 }
  0xfa   : > { %v702_v33 = vpop.f32.mrb[7].mxu0  ;;  %v756_v40 = vmax.f32 %v698_v52, 0.0  ;;  %v708_v42 = vadd.f32 %v2380_v30, %v3166_v9 }
  0xfb   : > { %2193 = vmatmul.mubr.msk.f32.gmra.mrb[4].mxu1 %vm557_vm0, %v753_v28 }
  0xfc   : > { %911 = vmatprep.mubr.f32.mxu1 %v2690_v22  ;;  %2578 = vmatpush1.bf16.msra.mxu1 %v2958_v58  ;;  %v703_v58 = vadd.f32 %v3166_v9, %v702_v33  ;;  %v758_v47 = vmax.f32 %v708_v42, 0.0 }
  0xfd   : > { %v2383_v34 = vpop.f32.mrb[8].mxu0  ;;  %2563 = vmatprep.subr.bf16.mxu1 %v2961_v59 }
  0xfe   : > { %v712_v35 = vpop.f32.mrb[9].mxu0 }
  0xff   : > { %2194 = vmatmul.mubr.msk.f32.gmra.mrb[6].mxu1 %vm557_vm0, %v754_v49 }
 0x100   : > { %917 = vmatprep.mubr.f32.mxu1 %v2690_v22  ;;  %2579 = vmatpush1.bf16.msra.mxu1 %v2976_v0  ;;  %v757_v0 = vmax.f32 %v703_v58, 0.0 }
 0x101   : > { %v2386_v53 = vpop.f32.mrb[10].mxu0  ;;  %2564 = vmatprep.subr.bf16.mxu1 %v2979_v1 }
 0x102   : > { %v722_v39 = vpop.f32.mrb[11].mxu0 }
 0x103   : > { %2195 = vmatmul.mubr.msk.f32.gmra.mrb[8].mxu1 %vm557_vm0, %v755_v36 }
 0x104   : > { %923 = vmatprep.mubr.f32.mxu1 %v2690_v22  ;;  %2580 = vmatpush1.bf16.msra.mxu1 %v2994_v6  ;;  %v713_v6 = vadd.f32 %v3166_v9, %v712_v35 }
 0x105   : > { %v2389_v59 = vpop.f32.mrb[12].mxu0  ;;  %2565 = vmatprep.subr.bf16.mxu1 %v2997_v7  ;;  %v718_v7 = vadd.f32 %v2383_v34, %v3166_v9 }
 0x106   : > { %v732_v41 = vpop.f32.mrb[13].mxu0  ;;  %v759_v48 = vmax.f32 %v713_v6, 0.0  ;;  %v771_v6 = vlaneseq }
 0x107   : > { %2196 = vmatmul.mubr.msk.f32.gmra.mrb[10].mxu1 %vm557_vm0, %v756_v40 }
 0x108   : > { %929 = vmatprep.mubr.f32.mxu1 %v2690_v22  ;;  %2581 = vmatpush1.bf16.msra.mxu1 %v3012_v12  ;;  %v760_v12 = vmax.f32 %v718_v7, 0.0  ;;  %v3330_v7 = vshrl.u32 %v771_v6, 7 }
 0x109   : > { %v2392_v1 = vpop.f32.mrb[14].mxu0  ;;  %2566 = vmatprep.subr.bf16.mxu1 %v3015_v13  ;;  %v723_v13 = vadd.f32 %v3166_v9, %v722_v39 }
 0x10a   : > { %v742_v46 = vpop.f32.mrb[15].mxu0 }
 0x10b   : > { %2197 = vmatmul.mubr.msk.f32.gmra.mrb[12].mxu1 %vm557_vm0, %v757_v0 }
 0x10c   : > { %935 = vmatprep.mubr.f32.mxu1 %v2690_v22  ;;  %2582 = vmatpush1.bf16.msra.mxu1 %v3030_v18  ;;  %v728_v18 = vadd.f32 %v2386_v53, %v3166_v9 }
 0x10d   : > { %2567 = vmatprep.subr.bf16.mxu1 %v3033_v19  ;;  %v761_v19 = vmax.f32 %v723_v13, 0.0  ;;  %v1129_v60 = vpop.f32.mrb[16].mxu0  ;;  %v777_v13 = vsub.s32 1, %v3330_v7 }
 0x10e   : > { %v1131_v2 = vpop.f32.mrb[17].mxu0 }
 0x10f   : > { %2198 = vmatmul.mubr.msk.f32.gmra.mrb[14].mxu1 %vm557_vm0, %v758_v47 }
 0x110   : > { %941 = vmatprep.mubr.f32.mxu1 %v2690_v22  ;;  %2583 = vmatpush1.bf16.msra.mxu1 %v3048_v25  ;;  %v762_v25 = vmax.f32 %v728_v18, 0.0 }
 0x111   : > { %2568 = vmatprep.subr.bf16.mxu1 %v3051_v26  ;;  %v733_v26 = vadd.f32 %v3166_v9, %v732_v41  ;;  %v1135_v4 = vpop.f32.mrb[18].mxu0 }
 0x113   : > { %2199 = vmatmul.mubr.msk.f32.gmra.mrb[16].mxu1 %vm557_vm0, %v759_v48  ;;  %v773_v48 = vsub.s32 0, %v3330_v7 }
 0x114   : > { %947 = vmatprep.mubr.f32.mxu1 %v2690_v22  ;;  %2584 = vmatpush1.bf16.msra.mxu1 %v3066_v31  ;;  %v738_v31 = vadd.f32 %v2389_v59, %v3166_v9 }
 0x115   : > { %2569 = vmatprep.subr.bf16.mxu1 %v3069_v32  ;;  %v763_v32 = vmax.f32 %v733_v26, 0.0 }
 0x117   : > { %2200 = vmatmul.mubr.msk.f32.gmra.mrb[18].mxu1 %vm557_vm0, %v760_v12  ;;  %v769_v12 = vld [vmem:[%s3630_s8] sm:$0x3] }
 0x118   : > { %953 = vmatprep.mubr.f32.mxu1 %v2690_v22  ;;  %2585 = vmatpush1.bf16.msra.mxu1 %v3084_v37  ;;  %v764_v37 = vmax.f32 %v738_v31, 0.0  ;;  %v3337_v18 = vrot.slane %v769_v12, %v773_v48 }
 0x119   : > { %2570 = vmatprep.subr.bf16.mxu1 %v3087_v38  ;;  %v743_v38 = vadd.f32 %v3166_v9, %v742_v46  ;;  %v1760_v46 = vld [vmem:[%s3634_s12 + $0x88] sm:$0xff] }
 0x11b   : > { %2201 = vmatmul.mubr.msk.f32.gmra.mrb[20].mxu1 %vm557_vm0, %v761_v19  ;;  %v3339_v19 = vrot.slane %v769_v12, %v777_v13  ;;  %v1481_v12 = vld [vmem:[%s2799_s21] sm:$0xff] }
 0x11c   : > { %959 = vmatprep.mubr.f32.mxu1 %v2690_v22  ;;  %2586 = vmatpush1.bf16.msra.mxu1 %v3102_v43  ;;  %v748_v43 = vadd.f32 %v2392_v1, %v3166_v9  ;;  %v1759_v1 = vld [vmem:[%s3634_s12 + $0x80] sm:$0xff] }
 0x11d   : > { %2571 = vmatprep.subr.bf16.mxu1 %v3105_v44  ;;  %v765_v44 = vmax.f32 %v743_v38, 0.0  ;;  %v2496_v47 = vpack.c.bf16 %v1760_v46, %v1759_v1  ;;  %v1744_v1 = vld [vmem:[%s3634_s12 + $0x8] sm:$0xff] }
 0x11e   : > { %v766_v50 = vmax.f32 %v748_v43, 0.0 }
 0x11f   : > { %2202 = vmatmul.mubr.msk.f32.gmra.mrb[22].mxu1 %vm557_vm0, %v762_v25 }
 0x120   : > { %965 = vmatprep.mubr.f32.mxu1 %v2690_v22  ;;  %2587 = vmatpush1.bf16.msra.mxu1 %v3120_v51  ;;  %v1312_v51 = vld [vmem:[%s3633_s11 + $0x1c0] sm:$0xff] }
 0x121   : > { %2572 = vmatprep.subr.bf16.mxu1 %v3123_v54  ;;  %v1314_v54 = vld [vmem:[%s3633_s11 + $0x1d0] sm:$0xff] }
 0x122   : > { %v2486_v55 = vpack.c.bf16 %v1314_v54, %v1312_v51 }
 0x123   : > { %2203 = vmatmul.mubr.msk.f32.gmra.mrb[24].mxu1 %vm557_vm0, %v763_v32  ;;  %v1497_v32 = vld [vmem:[%s3632_s10] sm:$0xff] }
 0x124   : > { %971 = vmatprep.mubr.f32.mxu1 %v2690_v22  ;;  %2588 = vmatpush1.bf16.msra.mxu1 %v3138_v61  ;;  %v2488_v61 = vpack.c.bf16 %v1319_v57, %v1317_v56 }
 0x125   : > { %2573 = vmatprep.subr.bf16.mxu1 %v3141_v62  ;;  %2487 = vmatpush1.bf16.msra.mxu0 %v2486_v55  ;;  %v1316_v62 = vld [vmem:[%s3633_s11 + $0x1e0] sm:$0xff] }
 0x126   : > { %v2490_v3 = vpack.c.bf16 %v1318_v63, %v1316_v62  ;;  %2489 = vmatprep.subr.bf16.mxu0 %v2488_v61 }
 0x127   : > { %2204 = vmatmul.mubr.msk.f32.gmra.mrb[26].mxu1 %vm557_vm0, %v764_v37  ;;  %v1499_v37 = vld [vmem:[%s3632_s10 + $0x10] sm:$0xff] }
 0x128   : > { %977 = vmatprep.mubr.f32.mxu1 %v2690_v22  ;;  %2589 = vmatpush1.bf16.msra.mxu1 %v3156_v5  ;;  %v1137_v5 = vpop.f32.mrb[19].mxu0  ;;  %v2494_v51 = vpack.c.bf16 %v1499_v37, %v1497_v32  ;;  %v1745_v37 = vld [vmem:[%s3634_s12 + $0x10] sm:$0xff] }
 0x129   : > { %2574 = vmatprep.subr.bf16.mxu1 %v3159_v8  ;;  %2491 = vmatpush1.bf16.msra.mxu0 %v2490_v3  ;;  %v3261_v8 = vpop.f32.mrb[20].mxu0 }
 0x12a   : > { %v3263_v9 = vpop.f32.mrb[21].mxu0  ;;  %2493 = vmatprep.subr.bf16.mxu0 %v2492_v14 }
 0x12b   : > { %2205 = vmatmul.mubr.msk.f32.gmra.mrb[28].mxu1 %vm557_vm0, %v765_v44  ;;  %v3271_v15 = vpop.f32.mrb[22].mxu0 }
 0x12c   : > { %983 = vmatprep.mubr.f32.mxu1 %v2690_v22  ;;  %2590 = vmatpush1.bf16.msra.mxu1 %v2486_v55  ;;  %v3273_v16 = vpop.f32.mrb[23].mxu0 }
 0x12d   : > { %2575 = vmatprep.subr.bf16.mxu1 %v2488_v61  ;;  %v3275_v17 = vpop.f32.mrb[24].mxu0 }
 0x12e   : > { %v3277_v20 = vpop.f32.mrb[25].mxu0 }
 0x12f   : > { %2206 = vmatmul.mubr.msk.f32.gmra.mrb[30].mxu1 %vm557_vm0, %v766_v50  ;;  %v3279_v21 = vpop.f32.mrb[26].mxu0 }
 0x130   : > { %2591 = vmatpush1.bf16.msra.mxu1 %v2490_v3  ;;  %v3281_v23 = vpop.f32.mrb[27].mxu0 }
 0x131   : > { %v3283_v24 = vpop.f32.mrb[28].mxu0  ;;  %2497 = vmatprep.subr.bf16.mxu1 %v2496_v47 }
 0x132   : > { %v3285_v27 = vpop.f32.mrb[29].mxu0 }
 0x133   : > { %v3287_v28 = vpop.f32.mrb[30].mxu0 }
 0x134   : > { %v3289_v29 = vpop.f32.mrb[31].mxu0 }
 0x135   : > { %v3291_v30 = vpop.f32.mrb[32].mxu0 }
 0x136   : > { %v3293_v33 = vpop.f32.mrb[33].mxu0 }
 0x137   : > { %v3295_v45 = vpop.f32.mrb[34].mxu0 }
 0x138   : > { %v3297_v49 = vpop.f32.mrb[35].mxu0 }
 0x139   : > { %v3299_v34 = vpop.f32.mrb[36].mxu0 }
 0x13a   : > { %v3301_v35 = vpop.f32.mrb[37].mxu0 }
 0x13b   : > { %v3303_v52 = vpop.f32.mrb[38].mxu0 }
 0x13c   : > { %v3305_v36 = vpop.f32.mrb[39].mxu0 }
 0x13d   : > { %v3307_v53 = vpop.f32.mrb[40].mxu0 }
 0x13e   : > { %v3309_v39 = vpop.f32.mrb[41].mxu0 }
 0x141   : > { %v3311_v40 = vpop.f32.mrb[42].mxu0 }
 0x142   : > { %v3313_v58 = vpop.f32.mrb[43].mxu0 }
 0x145   : > { %v3315_v59 = vpop.f32.mrb[44].mxu0 }
 0x146   : > { %v3317_v41 = vpop.f32.mrb[45].mxu0 }
 0x149   : > { %v3319_v42 = vpop.f32.mrb[46].mxu0 }
 0x14a   : > { %v3321_v0 = vpop.f32.mrb[47].mxu0 }
 0x1c6   : > { %v895_v25 = vpop.f32.mrb[0].mxu1 }
 0x1c7   : > { %v896_v26 = vadd.f32 %v895_v25, %v3337_v18  ;;  %v897_v31 = vpop.f32.mrb[1].mxu1 }
 0x1c8   : > { %v898_v38 = vadd.f32 %v897_v31, %v3339_v19 }
 0x1c9   : > { %v1224_v43 = vmul.f32 %v1129_v60, %v896_v26 }
 0x1ca   : > { %v1225_v44 = vmul.f32 %v1131_v2, %v898_v38  ;;  %v901_v50 = vpop.f32.mrb[2].mxu1  ;;  %v1763_v38 = vld [vmem:[%s3634_s12 + $0xa0] sm:$0xff] }
 0x1cb   : > { %v902_v54 = vadd.f32 %v901_v50, %v3337_v18  ;;  %v903_v55 = vpop.f32.mrb[3].mxu1 }
 0x1cc   : > { %v904_v56 = vadd.f32 %v903_v55, %v3339_v19  ;;  %1384 = vmatprep.mubr.f32.mxu0 %v1225_v44 }
 0x1cd   : > { %v1226_v57 = vmul.f32 %v1135_v4, %v902_v54  ;;  %1385 = vmatmul.mubr.f32.vlgmr.msra.gmra.mrb[48].mxu0 %v1224_v43  ;;  %v1764_v43 = vld [vmem:[%s3634_s12 + $0xa8] sm:$0xff] }
 0x1ce   : > { %v1227_v61 = vmul.f32 %v1137_v5, %v904_v56  ;;  %v907_v62 = vpop.f32.mrb[4].mxu1  ;;  %2495 = vmatpush1.bf16.msra.mxu0 %v2494_v51  ;;  %v1743_v5 = vld [vmem:[%s3634_s12] sm:$0xff]  ;;  %v1482_v51 = vld [vmem:[%s2799_s21 + $0x8] sm:$0xff] }
 0x1cf   : > { %v908_v63 = vadd.f32 %v907_v62, %v3337_v18  ;;  %v909_v3 = vpop.f32.mrb[5].mxu1  ;;  %v2498_v25 = vpack.c.bf16 %v1744_v1, %v1743_v5  ;;  %v1747_v62 = vld [vmem:[%s3634_s12 + $0x20] sm:$0xff] }
 0x1d0   : > { %v910_v10 = vadd.f32 %v909_v3, %v3339_v19  ;;  %1390 = vmatprep.mubr.f32.mxu0 %v1227_v61  ;;  %v2504_v61 = vpack.c.bf16 %v1764_v43, %v1763_v38  ;;  %v1766_v3 = vld [vmem:[%s3634_s12 + $0xb8] sm:$0xff]  ;;  %v1485_v38 = vld [vmem:[%s2799_s21 + $0x20] sm:$0xff] }
 0x1d1   : > { %v1228_v60 = vmul.f32 %v3261_v8, %v908_v63  ;;  %1391 = vmatmul.mubr.f32.gmra.mrb[50].mxu0 %v1226_v57  ;;  %v1761_v8 = vld [vmem:[%s3634_s12 + $0x90] sm:$0xff] }
 0x1d2   : > { %v1229_v2 = vmul.f32 %v3263_v9, %v910_v10  ;;  %v913_v11 = vpop.f32.mrb[6].mxu1  ;;  %v1762_v9 = vld [vmem:[%s3634_s12 + $0x98] sm:$0xff]  ;;  %v1765_v63 = vld [vmem:[%s3634_s12 + $0xb0] sm:$0xff] }
 0x1d3   : > { %v914_v14 = vadd.f32 %v913_v11, %v3337_v18  ;;  %v915_v4 = vpop.f32.mrb[7].mxu1  ;;  %v2500_v32 = vpack.c.bf16 %v1762_v9, %v1761_v8  ;;  %v2508_v1 = vpack.c.bf16 %v1766_v3, %v1765_v63  ;;  %v1767_v8 = vld [vmem:[%s3634_s12 + $0xc0] sm:$0xff]  ;;  %v1768_v9 = vld [vmem:[%s3634_s12 + $0xc8] sm:$0xff] }
 0x1d4   : > { %v916_v46 = vadd.f32 %v915_v4, %v3339_v19  ;;  %1396 = vmatprep.mubr.f32.mxu0 %v1229_v2  ;;  %v1483_v2 = vld [vmem:[%s2799_s21 + $0x10] sm:$0xff] }
 0x1d5   : > { %v1230_v47 = vmul.f32 %v3271_v15, %v914_v14  ;;  %1397 = vmatmul.mubr.f32.gmra.mrb[52].mxu0 %v1228_v60  ;;  %v1746_v15 = vld [vmem:[%s3634_s12 + $0x18] sm:$0xff] }
 0x1d6   : > { %v1231_v48 = vmul.f32 %v3273_v16, %v916_v46  ;;  %1614 = vmatprep.mubr.f32.mxu0 %v2690_v22  ;;  %v919_v13 = vpop.f32.mrb[8].mxu1  ;;  %v2502_v55 = vpack.c.bf16 %v1746_v15, %v1745_v37  ;;  %v1749_v46 = vld [vmem:[%s3634_s12 + $0x30] sm:$0xff]  ;;  %v1751_v37 = vld [vmem:[%s3634_s12 + $0x40] sm:$0xff] }
 0x1d7   : > { %v920_v26 = vadd.f32 %v919_v13, %v3337_v18  ;;  %v921_v31 = vpop.f32.mrb[9].mxu1 }
 0x1d8   : > { %1402 = vmatprep.mubr.f32.mxu1 %v1231_v48  ;;  %v922_v16 = vadd.f32 %v921_v31, %v3339_v19 }
 0x1d9   : > { %1403 = vmatmul.mubr.f32.vlgmr.msra.gmra.mrb[32].mxu1 %v1230_v47  ;;  %2225 = vmatmul.mubr.msk.f32.vlgmr.msra.gmra.mrb[54].mxu0 %vm1501_vm3, %v1481_v12  ;;  %v1232_v44 = vmul.f32 %v3275_v17, %v920_v26  ;;  %v1748_v17 = vld [vmem:[%s3634_s12 + $0x28] sm:$0xff]  ;;  %v1484_v12 = vld [vmem:[%s2799_s21 + $0x18] sm:$0xff] }
 0x1da   : > { %1620 = vmatprep.mubr.f32.mxu0 %v2690_v22  ;;  %v1233_v50 = vmul.f32 %v3277_v20, %v922_v16  ;;  %v925_v54 = vpop.f32.mrb[10].mxu1  ;;  %2499 = vmatpush3.bf16.msra.mxu1 %v2498_v25  ;;  %v2506_v14 = vpack.c.bf16 %v1748_v17, %v1747_v62 }
 0x1db   : > { %v926_v56 = vadd.f32 %v925_v54, %v3337_v18  ;;  %v927_v57 = vpop.f32.mrb[11].mxu1  ;;  %2501 = vmatprep.subr.bf16.mxu1 %v2500_v32  ;;  %v2512_v32 = vpack.c.bf16 %v1768_v9, %v1767_v8  ;;  %v1490_v9 = vld [vmem:[%s2799_s21 + $0x48] sm:$0xff] }
 0x1dc   : > { %v928_v20 = vadd.f32 %v927_v57, %v3339_v19  ;;  %1408 = vmatprep.mubr.f32.mxu1 %v1233_v50 }
 0x1dd   : > { %2226 = vmatmul.mubr.msk.f32.gmra.mrb[56].mxu0 %vm1501_vm3, %v1482_v51  ;;  %v1234_v10 = vmul.f32 %v3279_v21, %v926_v56  ;;  %1409 = vmatmul.mubr.f32.gmra.mrb[34].mxu1 %v1232_v44  ;;  %v1750_v21 = vld [vmem:[%s3634_s12 + $0x38] sm:$0xff] }
 0x1de   : > { %1626 = vmatprep.mubr.f32.mxu0 %v2690_v22  ;;  %v1235_v60 = vmul.f32 %v3281_v23, %v928_v20  ;;  %v931_v11 = vpop.f32.mrb[12].mxu1  ;;  %2503 = vmatpush3.bf16.msra.mxu1 %v2502_v55  ;;  %v2510_v25 = vpack.c.bf16 %v1750_v21, %v1749_v46  ;;  %v1486_v55 = vld [vmem:[%s2799_s21 + $0x28] sm:$0xff] }
 0x1df   : > { %v932_v4 = vadd.f32 %v931_v11, %v3337_v18  ;;  %v933_v5 = vpop.f32.mrb[13].mxu1  ;;  %2505 = vmatprep.subr.bf16.mxu1 %v2504_v61 }
 0x1e0   : > { %v934_v23 = vadd.f32 %v933_v5, %v3339_v19  ;;  %1414 = vmatprep.mubr.f32.mxu1 %v1235_v60 }
 0x1e1   : > { %2227 = vmatmul.mubr.msk.f32.gmra.mrb[58].mxu0 %vm1501_vm3, %v1483_v2  ;;  %v1236_v47 = vmul.f32 %v3283_v24, %v932_v4  ;;  %1415 = vmatmul.mubr.f32.gmra.mrb[36].mxu1 %v1234_v10  ;;  %v1752_v24 = vld [vmem:[%s3634_s12 + $0x48] sm:$0xff]  ;;  %v1488_v2 = vld [vmem:[%s2799_s21 + $0x38] sm:$0xff] }
 0x1e2   : > { %1632 = vmatprep.mubr.f32.mxu0 %v2690_v22  ;;  %v1237_v48 = vmul.f32 %v3285_v27, %v934_v23  ;;  %v937_v13 = vpop.f32.mrb[14].mxu1  ;;  %2507 = vmatpush3.bf16.msra.mxu1 %v2506_v14  ;;  %v2514_v44 = vpack.c.bf16 %v1752_v24, %v1751_v37  ;;  %v1492_v24 = vld [vmem:[%s2799_s21 + $0x58] sm:$0xff] }
 0x1e3   : > { %v938_v26 = vadd.f32 %v937_v13, %v3337_v18  ;;  %v939_v31 = vpop.f32.mrb[15].mxu1  ;;  %2509 = vmatprep.subr.bf16.mxu1 %v2508_v1  ;;  %v1489_v1 = vld [vmem:[%s2799_s21 + $0x40] sm:$0xff] }
 0x1e4   : > { %v940_v27 = vadd.f32 %v939_v31, %v3339_v19  ;;  %1420 = vmatprep.mubr.f32.mxu1 %v1237_v48 }
 0x1e5   : > { %2228 = vmatmul.mubr.msk.f32.gmra.mrb[60].mxu0 %vm1501_vm3, %v1484_v12  ;;  %v1238_v15 = vmul.f32 %v3287_v28, %v938_v26  ;;  %1421 = vmatmul.mubr.f32.gmra.mrb[38].mxu1 %v1236_v47 }
 0x1e6   : > { %1638 = vmatprep.mubr.f32.mxu0 %v2690_v22  ;;  %v1239_v16 = vmul.f32 %v3289_v29, %v940_v27  ;;  %v943_v43 = vpop.f32.mrb[16].mxu1  ;;  %2511 = vmatpush3.bf16.msra.mxu1 %v2510_v25  ;;  %v1491_v25 = vld [vmem:[%s2799_s21 + $0x50] sm:$0xff] }
 0x1e7   : > { %v944_v50 = vadd.f32 %v943_v43, %v3337_v18  ;;  %v945_v51 = vpop.f32.mrb[17].mxu1  ;;  %2513 = vmatprep.subr.bf16.mxu1 %v2512_v32  ;;  %v1770_v43 = vld [vmem:[%s3634_s12 + $0xd8] sm:$0xff] }
 0x1e8   : > { %v946_v54 = vadd.f32 %v945_v51, %v3339_v19  ;;  %1426 = vmatprep.mubr.f32.mxu1 %v1239_v16  ;;  %v1754_v51 = vld [vmem:[%s3634_s12 + $0x58] sm:$0xff] }
 0x1e9   : > { %2229 = vmatmul.mubr.msk.f32.gmra.mrb[62].mxu0 %vm1501_vm3, %v1485_v38  ;;  %v1240_v28 = vmul.f32 %v3291_v30, %v944_v50  ;;  %1427 = vmatmul.mubr.f32.gmra.mrb[40].mxu1 %v1238_v15  ;;  %v1493_v38 = vld [vmem:[%s2799_s21 + $0x60] sm:$0xff] }
 0x1ea   : > { %1644 = vmatprep.mubr.f32.mxu0 %v2690_v22  ;;  %v1241_v29 = vmul.f32 %v3293_v33, %v946_v54  ;;  %v949_v56 = vpop.f32.mrb[18].mxu1  ;;  %2515 = vmatpush3.bf16.msra.mxu1 %v2514_v44  ;;  %v1487_v33 = vld [vmem:[%s2799_s21 + $0x30] sm:$0xff] }
 0x1eb   : > { %v950_v57 = vadd.f32 %v949_v56, %v3337_v18  ;;  %v951_v61 = vpop.f32.mrb[19].mxu1  ;;  %v1753_v44 = vld [vmem:[%s3634_s12 + $0x50] sm:$0xff]  ;;  %v1755_v56 = vld [vmem:[%s3634_s12 + $0x60] sm:$0xff] }
 0x1ec   : > { %v952_v62 = vadd.f32 %v951_v61, %v3339_v19  ;;  %1432 = vmatprep.mubr.f32.mxu1 %v1241_v29  ;;  %v2518_v54 = vpack.c.bf16 %v1754_v51, %v1753_v44  ;;  %v1772_v29 = vld [vmem:[%s3634_s12 + $0xe8] sm:$0xff] }
 0x1ed   : > { %2230 = vmatmul.mubr.msk.f32.gmra.mrb[64].mxu0 %vm1501_vm3, %v1486_v55  ;;  %v1242_v30 = vmul.f32 %v3295_v45, %v950_v57  ;;  %1433 = vmatmul.mubr.f32.gmra.mrb[42].mxu1 %v1240_v28  ;;  %v1771_v28 = vld [vmem:[%s3634_s12 + $0xe0] sm:$0xff]  ;;  %v1756_v57 = vld [vmem:[%s3634_s12 + $0x68] sm:$0xff] }
 0x1ee   : > { %1650 = vmatprep.mubr.f32.mxu0 %v2690_v22  ;;  %v1243_v17 = vmul.f32 %v3297_v49, %v952_v62  ;;  %v955_v20 = vpop.f32.mrb[20].mxu1  ;;  %v2520_v55 = vpack.c.bf16 %v1772_v29, %v1771_v28  ;;  %v2522_v61 = vpack.c.bf16 %v1756_v57, %v1755_v56  ;;  %v1773_v62 = vld [vmem:[%s3634_s12 + $0xf0] sm:$0xff] }
 0x1ef   : > { %v956_v63 = vadd.f32 %v955_v20, %v3337_v18  ;;  %v957_v3 = vpop.f32.mrb[21].mxu1  ;;  %v1758_v20 = vld [vmem:[%s3634_s12 + $0x78] sm:$0xff] }
 0x1f0   : > { %v958_v10 = vadd.f32 %v957_v3, %v3339_v19  ;;  %1438 = vmatprep.mubr.f32.mxu1 %v1243_v17 }
 0x1f1   : > { %2231 = vmatmul.mubr.msk.f32.gmra.mrb[66].mxu0 %vm1501_vm3, %v1487_v33  ;;  %v1244_v60 = vmul.f32 %v3299_v34, %v956_v63  ;;  %1439 = vmatmul.mubr.f32.gmra.mrb[44].mxu1 %v1242_v30  ;;  %v1774_v30 = vld [vmem:[%s3634_s12 + $0xf8] sm:$0xff]  ;;  %v1757_v33 = vld [vmem:[%s3634_s12 + $0x70] sm:$0xff] }
 0x1f2   : > { %1656 = vmatprep.mubr.f32.mxu0 %v2690_v22  ;;  %v1245_v45 = vmul.f32 %v3301_v35, %v958_v10  ;;  %v961_v49 = vpop.f32.mrb[22].mxu1  ;;  %v2524_v17 = vpack.c.bf16 %v1774_v30, %v1773_v62  ;;  %v2526_v63 = vpack.c.bf16 %v1758_v20, %v1757_v33 }
 0x1f3   : > { %v962_v11 = vadd.f32 %v961_v49, %v3337_v18  ;;  %v963_v14 = vpop.f32.mrb[23].mxu1 }
 0x1f4   : > { %v964_v4 = vadd.f32 %v963_v14, %v3339_v19  ;;  %1444 = vmatprep.mubr.f32.mxu1 %v1245_v45 }
 0x1f5   : > { %2232 = vmatmul.mubr.msk.f32.gmra.mrb[68].mxu0 %vm1501_vm3, %v1488_v2  ;;  %v1246_v5 = vmul.f32 %v3303_v52, %v962_v11  ;;  %1445 = vmatmul.mubr.f32.gmra.mrb[46].mxu1 %v1244_v60 }
 0x1f6   : > { %1662 = vmatprep.mubr.f32.mxu0 %v2690_v22  ;;  %v1247_v34 = vmul.f32 %v3305_v36, %v964_v4  ;;  %v967_v35 = vpop.f32.mrb[24].mxu1 }
 0x1f7   : > { %v968_v46 = vadd.f32 %v967_v35, %v3337_v18  ;;  %v969_v21 = vpop.f32.mrb[25].mxu1 }
 0x1f8   : > { %v970_v23 = vadd.f32 %v969_v21, %v3339_v19  ;;  %1450 = vmatprep.mubr.f32.mxu1 %v1247_v34 }
 0x1f9   : > { %2233 = vmatmul.mubr.msk.f32.gmra.mrb[70].mxu0 %vm1501_vm3, %v1489_v1  ;;  %v1248_v8 = vmul.f32 %v3307_v53, %v968_v46  ;;  %1451 = vmatmul.mubr.f32.gmra.mrb[48].mxu1 %v1246_v5 }
 0x1fa   : > { %1668 = vmatprep.mubr.f32.mxu0 %v2690_v22  ;;  %v1249_v52 = vmul.f32 %v3309_v39, %v970_v23  ;;  %v973_v36 = vpop.f32.mrb[26].mxu1 }
 0x1fb   : > { %v974_v47 = vadd.f32 %v973_v36, %v3337_v18  ;;  %v975_v48 = vpop.f32.mrb[27].mxu1 }
 0x1fc   : > { %v976_v12 = vadd.f32 %v975_v48, %v3339_v19  ;;  %1456 = vmatprep.mubr.f32.mxu1 %v1249_v52 }
 0x1fd   : > { %2234 = vmatmul.mubr.msk.f32.gmra.mrb[72].mxu0 %vm1501_vm3, %v1490_v9  ;;  %v1250_v13 = vmul.f32 %v3311_v40, %v974_v47  ;;  %1457 = vmatmul.mubr.f32.gmra.mrb[50].mxu1 %v1248_v8 }
 0x1fe   : > { %1674 = vmatprep.mubr.f32.mxu0 %v2690_v22  ;;  %v1251_v53 = vmul.f32 %v3313_v58, %v976_v12  ;;  %v979_v39 = vpop.f32.mrb[28].mxu1 }
 0x1ff   : > { %v980_v26 = vadd.f32 %v979_v39, %v3337_v18  ;;  %v981_v31 = vpop.f32.mrb[29].mxu1 }
 0x200   : > { %v982_v32 = vadd.f32 %v981_v31, %v3339_v19  ;;  %1462 = vmatprep.mubr.f32.mxu1 %v1251_v53 }
 0x201   : > { %2235 = vmatmul.mubr.msk.f32.gmra.mrb[74].mxu0 %vm1501_vm3, %v1491_v25  ;;  %v1252_v37 = vmul.f32 %v3315_v59, %v980_v26  ;;  %1463 = vmatmul.mubr.f32.gmra.mrb[52].mxu1 %v1250_v13 }
 0x202   : > { %1680 = vmatprep.mubr.f32.mxu0 %v2690_v22  ;;  %v1253_v40 = vmul.f32 %v3317_v41, %v982_v32  ;;  %v985_v58 = vpop.f32.mrb[30].mxu1 }
 0x203   : > { %v986_v27 = vadd.f32 %v985_v58, %v3337_v18  ;;  %v987_v15 = vpop.f32.mrb[31].mxu1  ;;  %v1494_v18 = vld [vmem:[%s2799_s21 + $0x68] sm:$0xff] }
 0x204   : > { %v988_v16 = vadd.f32 %v987_v15, %v3339_v19  ;;  %1468 = vmatprep.mubr.f32.mxu1 %v1253_v40  ;;  %v1495_v19 = vld [vmem:[%s2799_s21 + $0x70] sm:$0xff] }
 0x205   : > { %2236 = vmatmul.mubr.msk.f32.gmra.mrb[76].mxu0 %vm1501_vm3, %v1492_v24  ;;  %v1254_v59 = vmul.f32 %v3319_v42, %v986_v27  ;;  %1469 = vmatmul.mubr.f32.gmra.mrb[54].mxu1 %v1252_v37  ;;  %v1496_v42 = vld [vmem:[%s2799_s21 + $0x78] sm:$0xff] }
 0x206   : > { %1686 = vmatprep.mubr.f32.mxu0 %v2690_v22  ;;  %v1255_v41 = vmul.f32 %v3321_v0, %v988_v16  ;;  %v1769_v0 = vld [vmem:[%s3634_s12 + $0xd0] sm:$0xff] }
 0x207   : > { %v2516_v50 = vpack.c.bf16 %v1770_v43, %v1769_v0 }
 0x208   : > { %1474 = vmatprep.mubr.f32.mxu1 %v1255_v41 }
 0x209   : > { %2237 = vmatmul.mubr.msk.f32.gmra.mrb[78].mxu0 %vm1501_vm3, %v1493_v38  ;;  %1475 = vmatmul.mubr.f32.gmra.mrb[56].mxu1 %v1254_v59 }
 0x20a   : > { %1692 = vmatprep.mubr.f32.mxu0 %v2690_v22  ;;  %2517 = vmatprep.subr.bf16.mxu1 %v2516_v50 }
 0x20b   : > { %2519 = vmatpush3.bf16.msra.mxu1 %v2518_v54 }
 0x20c   : > { %2521 = vmatprep.subr.bf16.mxu1 %v2520_v55 }
 0x20d   : > { %2238 = vmatmul.mubr.msk.f32.gmra.mrb[80].mxu0 %vm1501_vm3, %v1494_v18 }
 0x20e   : > { %1698 = vmatprep.mubr.f32.mxu0 %v2690_v22 }
 0x20f   : > { %2523 = vmatpush3.bf16.msra.mxu1 %v2522_v61 }
 0x210   : > { %2525 = vmatprep.subr.bf16.mxu1 %v2524_v17 }
 0x211   : > { %2239 = vmatmul.mubr.msk.f32.gmra.mrb[82].mxu0 %vm1501_vm3, %v1495_v19 }
 0x212   : > { %1704 = vmatprep.mubr.f32.mxu0 %v2690_v22 }
 0x213   : > { %2527 = vmatpush3.bf16.msra.mxu1 %v2526_v63 }
 0x215   : > { %2240 = vmatmul.mubr.msk.f32.gmra.mrb[84].mxu0 %vm1501_vm3, %v1496_v42 }
 0x2a0   : > { %v1386_v3 = vpop.f32.mrb[48].mxu0 }
 0x2a1   : > { %v1388_v10 = vpop.f32.mrb[49].mxu0 }
 0x2a4   : > { %v1392_v60 = vpop.f32.mrb[50].mxu0 }
 0x2a5   : > { %v1394_v45 = vpop.f32.mrb[51].mxu0 }
 0x2a8   : > { %v1398_v2 = vpop.f32.mrb[52].mxu0 }
 0x2a9   : > { %v1400_v49 = vpop.f32.mrb[53].mxu0 }
 0x2ac   : > { %v1404_v11 = vpop.f32.mrb[32].mxu1  ;;  %v1616_v14 = vpop.f32.mrb[54].mxu0 }
 0x2ad   : > { %v1711_v4 = vmul.f32 %v1616_v14, %v1386_v3  ;;  %v1406_v5 = vpop.f32.mrb[33].mxu1  ;;  %v1618_v34 = vpop.f32.mrb[55].mxu0 }
 0x2ae   : > { %v1712_v1 = vmul.f32 %v1618_v34, %v1388_v10 }
 0x2b0   : > { %v1622_v35 = vpop.f32.mrb[56].mxu0  ;;  %1844 = vmatprep.mubr.f32.mxu1 %v1712_v1  ;;  %v1410_v46 = vpop.f32.mrb[34].mxu1 }
 0x2b1   : > { %v1713_v21 = vmul.f32 %v1622_v35, %v1392_v60  ;;  %v1624_v23 = vpop.f32.mrb[57].mxu0  ;;  %1845 = vmatmul.mubr.f32.vlgmr.msra.gmra.mrb[58].mxu1 %v1711_v4  ;;  %v1412_v8 = vpop.f32.mrb[35].mxu1 }
 0x2b2   : > { %v1714_v52 = vmul.f32 %v1624_v23, %v1394_v45 }
 0x2b4   : > { %v1628_v9 = vpop.f32.mrb[58].mxu0  ;;  %1849 = vmatprep.mubr.f32.mxu1 %v1714_v52  ;;  %v1416_v36 = vpop.f32.mrb[36].mxu1 }
 0x2b5   : > { %v1715_v47 = vmul.f32 %v1628_v9, %v1398_v2  ;;  %v1630_v48 = vpop.f32.mrb[59].mxu0  ;;  %1850 = vmatmul.mubr.f32.gmra.mrb[60].mxu1 %v1713_v21  ;;  %v1418_v12 = vpop.f32.mrb[37].mxu1 }
 0x2b6   : > { %v1716_v13 = vmul.f32 %v1630_v48, %v1400_v49 }
 0x2b8   : > { %v1634_v53 = vpop.f32.mrb[60].mxu0  ;;  %1854 = vmatprep.mubr.f32.mxu1 %v1716_v13  ;;  %v1422_v25 = vpop.f32.mrb[38].mxu1 }
 0x2b9   : > { %v1717_v39 = vmul.f32 %v1634_v53, %v1404_v11  ;;  %v1636_v26 = vpop.f32.mrb[61].mxu0  ;;  %1855 = vmatmul.mubr.f32.gmra.mrb[62].mxu1 %v1715_v47  ;;  %v1424_v31 = vpop.f32.mrb[39].mxu1 }
 0x2ba   : > { %v1718_v32 = vmul.f32 %v1636_v26, %v1406_v5 }
 0x2bc   : > { %v1640_v37 = vpop.f32.mrb[62].mxu0  ;;  %1859 = vmatprep.mubr.f32.mxu1 %v1718_v32  ;;  %v1428_v40 = vpop.f32.mrb[40].mxu1 }
 0x2bd   : > { %v1719_v24 = vmul.f32 %v1640_v37, %v1410_v46  ;;  %v1642_v58 = vpop.f32.mrb[63].mxu0  ;;  %1860 = vmatmul.mubr.f32.gmra.mrb[64].mxu1 %v1717_v39  ;;  %v1430_v27 = vpop.f32.mrb[41].mxu1 }
 0x2be   : > { %v1720_v15 = vmul.f32 %v1642_v58, %v1412_v8 }
 0x2c0   : > { %v1646_v16 = vpop.f32.mrb[64].mxu0  ;;  %1864 = vmatprep.mubr.f32.mxu1 %v1720_v15  ;;  %v1434_v59 = vpop.f32.mrb[42].mxu1  ;;  %v3550_v15 = vld [vmem:[%s519_s17] ss:$0 sm:$0xff] }
 0x2c1   : > { %v1721_v41 = vmul.f32 %v1646_v16, %v1416_v36  ;;  %v1648_v38 = vpop.f32.mrb[65].mxu0  ;;  %1865 = vmatmul.mubr.f32.gmra.mrb[66].mxu1 %v1719_v24  ;;  %v1436_v18 = vpop.f32.mrb[43].mxu1  ;;  %vm1937_vm4 = vcmp.eq.s32.totalorder %v3330_v7, %v3550_v15  ;;  %v2691_v16 = vmov 1.0  }
 0x2c2   : > { %v1722_v19 = vmul.f32 %v1648_v38, %v1418_v12  ;;  %2425 = vmatprep.mubr.msk.f32.mxu0 %vm1937_vm4, %v2691_v16 }
 0x2c4   : > { %v1652_v42 = vpop.f32.mrb[66].mxu0  ;;  %1869 = vmatprep.mubr.f32.mxu1 %v1722_v19  ;;  %v1440_v0 = vpop.f32.mrb[44].mxu1 }
 0x2c5   : > { %v1723_v43 = vmul.f32 %v1652_v42, %v1422_v25  ;;  %v1654_v44 = vpop.f32.mrb[67].mxu0  ;;  %1870 = vmatmul.mubr.f32.gmra.mrb[68].mxu1 %v1721_v41  ;;  %v1442_v50 = vpop.f32.mrb[45].mxu1 }
 0x2c6   : > { %v1724_v51 = vmul.f32 %v1654_v44, %v1424_v31 }
 0x2c8   : > { %v1658_v54 = vpop.f32.mrb[68].mxu0  ;;  %1874 = vmatprep.mubr.f32.mxu1 %v1724_v51  ;;  %v1446_v28 = vpop.f32.mrb[46].mxu1 }
 0x2c9   : > { %v1725_v29 = vmul.f32 %v1658_v54, %v1428_v40  ;;  %v1660_v55 = vpop.f32.mrb[69].mxu0  ;;  %1875 = vmatmul.mubr.f32.gmra.mrb[70].mxu1 %v1723_v43  ;;  %v1448_v56 = vpop.f32.mrb[47].mxu1 }
 0x2ca   : > { %v1726_v57 = vmul.f32 %v1660_v55, %v1430_v27 }
 0x2cc   : > { %v1664_v61 = vpop.f32.mrb[70].mxu0  ;;  %1879 = vmatprep.mubr.f32.mxu1 %v1726_v57  ;;  %v1452_v62 = vpop.f32.mrb[48].mxu1 }
 0x2cd   : > { %v1727_v30 = vmul.f32 %v1664_v61, %v1434_v59  ;;  %v1666_v17 = vpop.f32.mrb[71].mxu0  ;;  %1880 = vmatmul.mubr.f32.gmra.mrb[72].mxu1 %v1725_v29  ;;  %v1454_v33 = vpop.f32.mrb[49].mxu1  ;;  %v1776_v59 = vand.u32 127, %v771_v6 }
 0x2ce   : > { %v1728_v20 = vmul.f32 %v1666_v17, %v1436_v18 }
 0x2cf   : > { %vm1777_vm5 = vcmp.eq.s32.totalorder %v1776_v59, 16 }
 0x2d0   : > { %v1670_v63 = vpop.f32.mrb[72].mxu0  ;;  %1884 = vmatprep.mubr.f32.mxu1 %v1728_v20  ;;  %v1458_v3 = vpop.f32.mrb[50].mxu1  ;;  %v3557_v42 = vsel %vm1777_vm5, 1.0, %v2690_v22 }
 0x2d1   : > { %v1729_v10 = vmul.f32 %v1670_v63, %v1440_v0  ;;  %v1672_v60 = vpop.f32.mrb[73].mxu0  ;;  %1885 = vmatmul.mubr.f32.gmra.mrb[74].mxu1 %v1727_v30  ;;  %v1460_v45 = vpop.f32.mrb[51].mxu1 }
 0x2d2   : > { %v1730_v2 = vmul.f32 %v1672_v60, %v1442_v50 }
 0x2d4   : > { %v1676_v49 = vpop.f32.mrb[74].mxu0  ;;  %1889 = vmatprep.mubr.f32.mxu1 %v1730_v2  ;;  %v1464_v11 = vpop.f32.mrb[52].mxu1 }
 0x2d5   : > { %v1731_v14 = vmul.f32 %v1676_v49, %v1446_v28  ;;  %v1678_v4 = vpop.f32.mrb[75].mxu0  ;;  %1890 = vmatmul.mubr.f32.gmra.mrb[76].mxu1 %v1729_v10  ;;  %v1466_v5 = vpop.f32.mrb[53].mxu1 }
 0x2d6   : > { %v1732_v34 = vmul.f32 %v1678_v4, %v1448_v56 }
 0x2d8   : > { %v1682_v1 = vpop.f32.mrb[76].mxu0  ;;  %1894 = vmatprep.mubr.f32.mxu1 %v1732_v34  ;;  %v1470_v35 = vpop.f32.mrb[54].mxu1 }
 0x2d9   : > { %v1733_v46 = vmul.f32 %v1682_v1, %v1452_v62  ;;  %v1684_v21 = vpop.f32.mrb[77].mxu0  ;;  %1895 = vmatmul.mubr.f32.gmra.mrb[78].mxu1 %v1731_v14  ;;  %v1472_v23 = vpop.f32.mrb[55].mxu1 }
 0x2da   : > { %v1734_v8 = vmul.f32 %v1684_v21, %v1454_v33 }
 0x2dc   : > { %v1688_v52 = vpop.f32.mrb[78].mxu0  ;;  %1899 = vmatprep.mubr.f32.mxu1 %v1734_v8  ;;  %v1476_v9 = vpop.f32.mrb[56].mxu1 }
 0x2dd   : > { %v1735_v36 = vmul.f32 %v1688_v52, %v1458_v3  ;;  %v1690_v47 = vpop.f32.mrb[79].mxu0  ;;  %1900 = vmatmul.mubr.f32.gmra.mrb[80].mxu1 %v1733_v46  ;;  %v1478_v48 = vpop.f32.mrb[57].mxu1 }
 0x2de   : > { %v1736_v12 = vmul.f32 %v1690_v47, %v1460_v45 }
 0x2e0   : > { %v1694_v13 = vpop.f32.mrb[80].mxu0  ;;  %1904 = vmatprep.mubr.f32.mxu1 %v1736_v12 }
 0x2e1   : > { %v1737_v53 = vmul.f32 %v1694_v13, %v1464_v11  ;;  %v1696_v25 = vpop.f32.mrb[81].mxu0  ;;  %1905 = vmatmul.mubr.f32.gmra.mrb[82].mxu1 %v1735_v36 }
 0x2e2   : > { %v1738_v39 = vmul.f32 %v1696_v25, %v1466_v5 }
 0x2e4   : > { %v1700_v26 = vpop.f32.mrb[82].mxu0  ;;  %1909 = vmatprep.mubr.f32.mxu1 %v1738_v39 }
 0x2e5   : > { %v1739_v31 = vmul.f32 %v1700_v26, %v1470_v35  ;;  %v1702_v32 = vpop.f32.mrb[83].mxu0  ;;  %1910 = vmatmul.mubr.f32.gmra.mrb[84].mxu1 %v1737_v53 }
 0x2e6   : > { %v1740_v37 = vmul.f32 %v1702_v32, %v1472_v23 }
 0x2e8   : > { %v1706_v40 = vpop.f32.mrb[84].mxu0  ;;  %1914 = vmatprep.mubr.f32.mxu1 %v1740_v37 }
 0x2e9   : > { %v1741_v24 = vmul.f32 %v1706_v40, %v1476_v9  ;;  %v1708_v58 = vpop.f32.mrb[85].mxu0  ;;  %1915 = vmatmul.mubr.f32.gmra.mrb[86].mxu1 %v1739_v31 }
 0x2ea   : > { %v1742_v27 = vmul.f32 %v1708_v58, %v1478_v48 }
 0x2ec   : > { %1919 = vmatprep.mubr.f32.mxu1 %v1742_v27 }
 0x2ed   : > { %1920 = vmatmul.mubr.f32.gmra.mrb[88].mxu1 %v1741_v24 }
 0x384   : > { %v2301_v41 = vpop.f32.mrb[58].mxu1 }
 0x385   : > { %v2302_v38 = vpop.f32.mrb[59].mxu1 }
 0x386   : > { %v2303_v18 = vadd.f32 %v2302_v38, %v2301_v41 }
 0x388   : > { %v2304_v19 = vpop.f32.mrb[60].mxu1  ;;  %v1847_v44 = vadd.f32 %v2303_v18, %v3557_v42 }
 0x389   : > { %v2305_v0 = vpop.f32.mrb[61].mxu1 }
 0x38a   : > { %v2306_v43 = vadd.f32 %v2305_v0, %v2304_v19 }
 0x38c   : > { %v1852_v50 = vadd.f32 %v2306_v43, %v3557_v42  ;;  %v2307_v51 = vpop.f32.mrb[62].mxu1 }
 0x38d   : > { %v2308_v54 = vpop.f32.mrb[63].mxu1 }
 0x38e   : > { %v2309_v28 = vadd.f32 %v2308_v54, %v2307_v51  ;;  %v2528_v29 = vpack.c.bf16 %v1852_v50, %v1847_v44 }
 0x390   : > { %v2310_v55 = vpop.f32.mrb[64].mxu1  ;;  %2529 = vmatprep.subr.bf16.mxu0 %v2528_v29  ;;  %v1857_v57 = vadd.f32 %v2309_v28, %v3557_v42 }
 0x391   : > { %v2311_v6 = vpop.f32.mrb[65].mxu1  ;;  %2531 = vmatpush3.bf16.msra.mxu0 %v2528_v29  ;;  %v1928_v29 = vadd.s32 8, %v3330_v7 }
 0x392   : > { %v2312_v56 = vadd.f32 %v2311_v6, %v2310_v55  ;;  %v1944_v6 = vld [vmem:[#allocation2 + $0x8] sm:$0xff] }
 0x393   : > { %vm1938_vm6 = vcmp.eq.s32.totalorder %v1928_v29, %v3550_v15 }
 0x394   : > { %v1862_v22 = vadd.f32 %v2312_v56, %v3557_v42  ;;  %v2313_v61 = vpop.f32.mrb[66].mxu1  ;;  %v1943_v56 = vld [vmem:[#allocation2] sm:$0xff] }
 0x395   : > { %v2314_v62 = vpop.f32.mrb[67].mxu1 }
 0x396   : > { %v2315_v30 = vadd.f32 %v2314_v62, %v2313_v61  ;;  %v2532_v17 = vpack.c.bf16 %v1862_v22, %v1857_v57 }
 0x398   : > { %v2316_v33 = vpop.f32.mrb[68].mxu1  ;;  %2533 = vmatprep.subr.bf16.mxu0 %v2532_v17  ;;  %v1867_v3 = vadd.f32 %v2315_v30, %v3557_v42  ;;  %v2692_v30 = vmov (!%p2247_p7), 16  }
 0x399   : > { %v2317_v20 = vpop.f32.mrb[69].mxu1  ;;  %2535 = vmatpush3.bf16.msra.mxu0 %v2532_v17  ;;  %2630 = vset.pattern.permute.xlu0 (!%p2247_p7), %v2692_v30 }
 0x39a   : > { %v2318_v63 = vadd.f32 %v2317_v20, %v2316_v33  ;;  %v2046_v20 = vld [vmem:[%s3626_s4] sm:$0xff] (!%p2247_p7) }
 0x39c   : > { %v1872_v10 = vadd.f32 %v2318_v63, %v3557_v42  ;;  %v2319_v60 = vpop.f32.mrb[70].mxu1 }
 0x39d   : > { %v2320_v45 = vpop.f32.mrb[71].mxu1 }
 0x39e   : > { %v2321_v2 = vadd.f32 %v2320_v45, %v2319_v60  ;;  %v2536_v49 = vpack.c.bf16 %v1872_v10, %v1867_v3  ;;  %v2047_v60 = vld [vmem:[%s3626_s4 + $0x8] sm:$0xff] (!%p2247_p7) }
 0x3a0   : > { %v2322_v11 = vpop.f32.mrb[72].mxu1  ;;  %2537 = vmatprep.subr.bf16.mxu0 %v2536_v49  ;;  %v1877_v5 = vadd.f32 %v2321_v2, %v3557_v42 }
 0x3a1   : > { %v2323_v14 = vpop.f32.mrb[73].mxu1  ;;  %2539 = vmatpush3.bf16.msra.mxu0 %v2536_v49 }
 0x3a2   : > { %v2324_v4 = vadd.f32 %v2323_v14, %v2322_v11 }
 0x3a4   : > { %v1882_v34 = vadd.f32 %v2324_v4, %v3557_v42  ;;  %v2325_v1 = vpop.f32.mrb[74].mxu1 }
 0x3a5   : > { %v2326_v35 = vpop.f32.mrb[75].mxu1 }
 0x3a6   : > { %v2327_v46 = vadd.f32 %v2326_v35, %v2325_v1  ;;  %v2540_v21 = vpack.c.bf16 %v1882_v34, %v1877_v5 }
 0x3a8   : > { %v2328_v23 = vpop.f32.mrb[76].mxu1  ;;  %2541 = vmatprep.subr.bf16.mxu0 %v2540_v21  ;;  %v1887_v9 = vadd.f32 %v2327_v46, %v3557_v42 }
 0x3a9   : > { %v2329_v8 = vpop.f32.mrb[77].mxu1  ;;  %2543 = vmatpush3.bf16.msra.mxu0 %v2540_v21 }
 0x3aa   : > { %v2330_v52 = vadd.f32 %v2329_v8, %v2328_v23 }
 0x3ac   : > { %v1892_v36 = vadd.f32 %v2330_v52, %v3557_v42  ;;  %v2331_v47 = vpop.f32.mrb[78].mxu1 }
 0x3ad   : > { %v2332_v48 = vpop.f32.mrb[79].mxu1 }
 0x3ae   : > { %v2333_v12 = vadd.f32 %v2332_v48, %v2331_v47  ;;  %v2544_v13 = vpack.c.bf16 %v1892_v36, %v1887_v9 }
 0x3b0   : > { %v2334_v53 = vpop.f32.mrb[80].mxu1  ;;  %2545 = vmatprep.subr.bf16.mxu0 %v2544_v13  ;;  %v1897_v26 = vadd.f32 %v2333_v12, %v3557_v42 }
 0x3b1   : > { %v2335_v25 = vpop.f32.mrb[81].mxu1  ;;  %2547 = vmatpush3.bf16.msra.mxu0 %v2544_v13 }
 0x3b2   : > { %v2336_v39 = vadd.f32 %v2335_v25, %v2334_v53 }
 0x3b4   : > { %v1902_v31 = vadd.f32 %v2336_v39, %v3557_v42  ;;  %v2337_v32 = vpop.f32.mrb[82].mxu1 }
 0x3b5   : > { %v2338_v37 = vpop.f32.mrb[83].mxu1 }
 0x3b6   : > { %v2339_v40 = vadd.f32 %v2338_v37, %v2337_v32  ;;  %v2548_v24 = vpack.c.bf16 %v1902_v31, %v1897_v26 }
 0x3b8   : > { %v2340_v58 = vpop.f32.mrb[84].mxu1  ;;  %2549 = vmatprep.subr.bf16.mxu0 %v2548_v24  ;;  %v1907_v41 = vadd.f32 %v2339_v40, %v3557_v42 }
 0x3b9   : > { %v2341_v27 = vpop.f32.mrb[85].mxu1  ;;  %2551 = vmatpush3.bf16.msra.mxu0 %v2548_v24 }
 0x3ba   : > { %v2342_v59 = vadd.f32 %v2341_v27, %v2340_v58 }
 0x3bc   : > { %v1912_v38 = vadd.f32 %v2342_v59, %v3557_v42  ;;  %v2343_v18 = vpop.f32.mrb[86].mxu1 }
 0x3bd   : > { %v2344_v19 = vpop.f32.mrb[87].mxu1 }
 0x3be   : > { %v2345_v0 = vadd.f32 %v2344_v19, %v2343_v18  ;;  %v2552_v43 = vpack.c.bf16 %v1912_v38, %v1907_v41 }
 0x3c0   : > { %v2346_v44 = vpop.f32.mrb[88].mxu1  ;;  %2553 = vmatprep.subr.bf16.mxu0 %v2552_v43  ;;  %v1917_v54 = vadd.f32 %v2345_v0, %v3557_v42 }
 0x3c1   : > { %v2347_v50 = vpop.f32.mrb[89].mxu1  ;;  %2555 = vmatpush3.bf16.msra.mxu0 %v2552_v43 }
 0x3c2   : > { %v2348_v51 = vadd.f32 %v2347_v50, %v2346_v44 }
 0x3c4   : > { %v1922_v28 = vadd.f32 %v2348_v51, %v3557_v42 }
 0x3c6   : > { %v2556_v55 = vpack.c.bf16 %v1922_v28, %v1917_v54 }
 0x3c8   : > { %2557 = vmatprep.subr.bf16.mxu0 %v2556_v55 }
 0x3c9   : > { %2559 = vmatpush3.bf16.msra.mxu0 %v2556_v55 }
 0x3cc   : > { %2426 = vmatmul.mubr.msk.f32.vlgmr.msra.gmra.mrb[86].mxu0 %vm1938_vm6, %v2691_v16 }
 0x49d   : > { %2027 = sbr.rel (%p2247_p7) target bundleno = 1345 (0x541), region = 80 }
 0x49f   : > { %v2427_v57 = vpop.f32.mrb[86].mxu0 }
 0x4a0   : > { %v2021_v22 = vadd.f32 %v2427_v57, %v1944_v6  ;;  %v2011_v61 = vpop.f32.mrb[87].mxu0 }
 0x4a1   : > { %v2020_v62 = vadd.f32 %v2011_v61, %v1943_v56 }
 0x4a2   : > { %2023 = vst [vmem:[#allocation2 + $0x8] sm:$0xff] %v2021_v22 }
 0x4a3   : > { %2022 = vst [vmem:[#allocation2] sm:$0xff] %v2020_v62 }
 0x4a9   : > { %v2029_v7 = vld [vmem:[#allocation2 + $0x8] sm:$0xff] }
 0x4aa   : > { %v2028_v42 = vld [vmem:[#allocation2] sm:$0xff]  ;;  %v2031_v33 = vmax.f32 %v2029_v7, 1.0 }
 0x4ab   : > { %v2030_v17 = vmax.f32 %v2028_v42, 1.0 }
 0x4ad   : > { %2631 = vrcp.f32 %v2030_v17 }
 0x4ae   : > { %2633 = vrcp.f32 %v2031_v33 }
 0x4b7   : > { %v2632_v15 = vpop.eup %2631 }
 0x4b8   : > { %2036 = vperm.xlu0 %2630, %v2632_v15   ;;  %v2634_v16 = vpop.eup %2633 }
 0x4bc   : > { %2041 = vperm.xlu0 %2630, %v2634_v16  }
 0x537   : > { %v2037_v63 = vpop.permute.xlu0 %2036 }
 0x538   : > { %v2044_v3 = vmul.f32 %v2037_v63, %v2028_v42 }
 0x53a   : > { %v2048_v10 = vadd.f32 %v2046_v20, %v2044_v3 }
 0x53b   : > { %v2042_v45 = vpop.permute.xlu0 %2041 }
 0x53c   : > { %2050 = vst [vmem:[#allocation2] sm:$0xff] %v2048_v10  ;;  %v2045_v2 = vmul.f32 %v2042_v45, %v2029_v7 }
 0x53e   : > { %v2049_v49 = vadd.f32 %v2047_v60, %v2045_v2 }
 0x540   : > { %2051 = vst [vmem:[#allocation2 + $0x8] sm:$0xff] %v2049_v49 }
 0x541 PF: > { %s3639_s23 = sadd.s32 4294967295, %s2687_s27   ;;  %s2693_s30 = smov [#allocation2]  }
 0x542   : > { %p3587_p8 = scmp.eq.s32.totalorder %s3639_s23, 2  ;;  %s2061_s15 = sshll.u32 %s2693_s30, 4  ;;  %s2062_s15 = int_to_ptr.vmem [resolvable:$true] %s2061_s15 }
 0x543   : > { %s2635_s28 = scalar_lea.vmem %s2062_s15, 256  ;;  %p2642_p12 = scmp.lt.s32.totalorder %s2062_s15, %s2062_s15 }
 0x544   : > { %p2636_p9 = scmp.ne.s32.totalorder %s2062_s15, %s2635_s28  ;;  %p2643_p13 = scmp.lt.s32.totalorder %s2635_s28, %s2635_s28 }
 0x546   : > { %p2637_p10 = pnand %p2636_p9, %p3587_p8  ;;  %p2644_p0 = por %p2643_p13, %p2642_p12 }
 0x548   : > { %p2638_p11 = pneg %p2637_p10 }
 0x54a   : > { %p2645_p1 = pnand %p2644_p0, %p2638_p11 }
 0x54c   : > { %2648 = shalt.err (!%p2645_p1)
}
 0x54d   : > { %s2649_s21 = scalar_lea.hbm %s3635_s13, 256 }
 0x54e   : > { %p2650_p2 = scmp.ne.s32.totalorder %s3635_s13, %s2649_s21  ;;  %p2655_p5 = scmp.lt.u32.totalorder %s2649_s21, %s3635_s13 }
 0x550   : > { %p2651_p3 = pnand %p2650_p2, %p3587_p8 }
 0x552   : > { %p2652_p4 = pneg %p2651_p3 }
 0x554   : > { %p2657_p6 = pnand %p2655_p5, %p2652_p4 }
 0x556   : > { %2660 = shalt.err (!%p2657_p6)
}
 0x557   : > { %s2694_s14 = smov 128   ;;  %s2695_s17 = smov 8  }
 0x558   : > { %2593 = dma.vmem_to_hbm [thread:$0]  (%p3587_p8), %s2062_s15, 256, %s3635_s13, [#allocation3], %s2694_s14, %s2694_s14, %s2695_s17  }
 0x559   : > { %2674 = dma.done.wait (%p3587_p8), [#allocation3], 256  }
 0x55a   : > { %2676 = vsyncadd (%p3587_p8), [#allocation3], 4294967040 }
 0x55b PF: > { %s24_s27 = sadd.s32 1, %s2687_s27   ;;  %s3641_s25 = sld [smem:[#allocation5_spill]] }
 0x55c   : > { %p21_p7 = scmp.ge.s32.totalorder %s24_s27, 5   ;;  %s3642_s26 = sld [smem:[#allocation6_spill]] }
 0x55e   :  { %23 = sbr.rel (!%p21_p7) target bundleno = 2 (0x2), region = 120 }
 0x565   :  { %2077 = vsyncpa [#allocation3], 1 }
 0x566   :  { %2079 = vsyncpa [#allocation3 + $0x1], 1 }

</bundles_post_ra>
